<compile_context>
chip_gen: v7x
topology: tpu7x:2x2x1
jax: 0.10.0
libtpu: 0.0.40
codegen_flags: <defaults>
</compile_context>

<pallas_src>
import functools
import math

import jax
import jax.numpy as jnp
from jax import lax
from jax.experimental import pallas as pl
from jax.experimental.pallas import tpu as pltpu


def _round_up(n, m):
    return ((n + m - 1) // m) * m


def _pick_chunk(sp):
    # Largest S-chunk (multiple of 8) dividing Sp, capped so the per-chunk
    # VMEM footprint stays bounded for long sequences.
    for c in (512, 256, 128, 64, 32, 16, 8):
        if sp % c == 0:
            return c
    return 8


def _gru_kernel(x_ref, wx_ref, burc_ref, wurh_ref, wch_ref, wy_ref, by_ref,
                y_ref, h_ref, hcarry_ref, xp_ref, *,
                chunk, hidden_size, approx_gates):
    """One S-chunk of the GRU: x-projection, serial recurrence, output proj."""
    hp = wch_ref.shape[0]  # padded hidden size (multiple of 128)

    # Initialize the carried hidden state on the first chunk only
    # (scratch persists across grid iterations).
    @pl.when(pl.program_id(0) == 0)
    def _():
        hcarry_ref[...] = jnp.zeros_like(hcarry_ref)

    # (1) Batched x-projection for all three gates of this chunk (MXU, off the
    #     serial path): (chunk, Ip) @ (Ip, 3*Hp) + [b_u | b_r | b_c].
    #     Operands may be bf16 (fast mode); accumulation is f32.
    xp_ref[...] = (jnp.dot(x_ref[...], wx_ref[...],
                           preferred_element_type=jnp.float32)
                   + burc_ref[...])

    # Lane mask keeping padded hidden lanes exactly zero each step (review
    # robustness concern; the zero-padded weights/biases already guarantee it
    # structurally, this makes it explicit at the cost of one VPU mul).
    if hidden_size < hp:
        lane = lax.broadcasted_iota(jnp.int32, (1, hp), 1)
        lane_mask = (lane < hidden_size).astype(jnp.float32)
    else:
        lane_mask = None

    def sigmoid(z):
        if approx_gates:
            # exp on EUP + approximate reciprocal on EUP (separate VLIW slot).
            return pl.reciprocal(1.0 + jnp.exp(-z), approx=True)
        return jax.nn.sigmoid(z)

    # (2) Serial recurrence over the chunk: 8 timesteps per fori iteration
    #     (bounded unroll) so h rows are stored back sublane-dense.
    def steps8(c, h):
        base = pl.multiple_of(c * 8, 8)
        rows = []
        for j in range(8):
            xp = xp_ref[pl.ds(base + j, 1), :]                       # (1, 3*Hp)
            # Recurrent weights are read from VMEM inside the step -- no vreg
            # hoist forced across the loop.
            # TODO(synk): drive the MXU explicitly (pltpu.matmul_push_rhs once
            # per chunk + matmul_acc_lhs/matmul_pop per step) to avoid
            # re-feeding the RHS every timestep.
            z_ur = (jnp.dot(h, wurh_ref[...],
                            preferred_element_type=jnp.float32)
                    + xp[:, :2 * hp])
            ur = sigmoid(z_ur)                                       # (1, 2*Hp)
            u = ur[:, :hp]
            r = ur[:, hp:]
            z_c = (jnp.dot(r * h, wch_ref[...],
                           preferred_element_type=jnp.float32)
                   + xp[:, 2 * hp:])
            h_cand = jnp.tanh(z_c)
            h = h + u * (h_cand - h)          # == u*h_cand + (1-u)*h
            if lane_mask is not None:
                h = h * lane_mask
            rows.append(h)
        h_ref[pl.ds(base, 8), :] = jnp.concatenate(rows, axis=0)
        return h

    h0 = hcarry_ref[...]                                             # (1, Hp)
    h_last = lax.fori_loop(0, chunk // 8, steps8, h0, unroll=False)
    hcarry_ref[...] = h_last

    # (3) Deferred output projection for this chunk: (chunk, Hp) @ (Hp, Op),
    #     lane-dense slab store (padded rows >= seq_len hold junk+bias and are
    #     sliced off in the wrapper -- do not reuse unsliced).
    y_ref[...] = (jnp.dot(h_ref[...].astype(wy_ref.dtype), wy_ref[...],
                          preferred_element_type=jnp.float32)
                  + by_ref[...])
    # TODO(synk): nn.Dropout is identity in eval mode; training-mode dropout
    # (stateful PRNG masking) is not reproduced here.


def gru_forward(X, params, *, precise=False):
    """X: (seq_len, input_size, 1). Returns (outputs, hidden_states) like PyTorch.

    precise=True : f32 projections + exact sigmoid (bit-close to reference).
    precise=False: bf16 MXU inputs for the batched projections + approximate
                   EUP reciprocal in the gate sigmoids (fast mode).
    """
    seq_len, input_size, _ = X.shape
    W_u, b_u, W_r, b_r, W_c, b_c, W_y, b_y = params
    hidden_size = W_u.shape[0]
    output_size = W_y.shape[0]

    proj_dtype = jnp.float32 if precise else jnp.bfloat16

    # Padded (lane/sublane friendly) dimensions.
    Hp = _round_up(max(hidden_size, 8), 128)
    Ip = _round_up(max(input_size, 8), 128)
    Op = _round_up(max(output_size, 8), 128)
    Sp = _round_up(max(seq_len, 1), 8)
    chunk = _pick_chunk(Sp)
    n_chunks = Sp // chunk

    def pad2(a, rows, cols, dtype=jnp.float32):
        out = jnp.zeros((rows, cols), dtype)
        return out.at[:a.shape[0], :a.shape[1]].set(a.astype(dtype))

    # Split the concatenated PyTorch weights, pre-transpose to (in_dim, out_dim).
    def split_t(W):
        return W[:, :hidden_size].T, W[:, hidden_size:].T   # (H,H), (I,H)

    wuh, wux = split_t(W_u)
    wrh, wrx = split_t(W_r)
    wch, wcx = split_t(W_c)

    # Fused recurrent gate weights (f32 recurrent path): h @ [W_u_h | W_r_h].
    w_urh = jnp.concatenate([pad2(wuh, Hp, Hp), pad2(wrh, Hp, Hp)], axis=1)
    wch_p = pad2(wch, Hp, Hp)                                       # (Hp, Hp)
    # Fused x-projection weights: x @ [W_u_x | W_r_x | W_c_x] -> (Ip, 3*Hp).
    w_x = jnp.concatenate([pad2(wux, Ip, Hp, proj_dtype),
                           pad2(wrx, Ip, Hp, proj_dtype),
                           pad2(wcx, Ip, Hp, proj_dtype)], axis=1)
    b_urc = jnp.concatenate([pad2(b_u.reshape(1, hidden_size), 1, Hp),
                             pad2(b_r.reshape(1, hidden_size), 1, Hp),
                             pad2(b_c.reshape(1, hidden_size), 1, Hp)], axis=1)
    wy_p = pad2(W_y.T, Hp, Op, proj_dtype)                          # (Hp, Op)
    by_p = pad2(b_y.reshape(1, output_size), 1, Op)

    x2d = pad2(X.reshape(seq_len, input_size), Sp, Ip, proj_dtype)

    # Explicit VMEM budget (review: default scoped limit is 16/32 MiB on
    # v5e/v6e-v7x).  Chunk blocks are double-buffered; weights (constant
    # index_map) are fetched once.  2x + slack for compiler temps.
    pbytes = jnp.dtype(proj_dtype).itemsize
    resident = (Ip * 3 * Hp * pbytes + 3 * Hp * 4
                + Hp * 2 * Hp * 4 + Hp * Hp * 4
                + Hp * Op * pbytes + Op * 4)
    per_chunk = chunk * (Ip * pbytes + Op * 4 + Hp * 4)
    scratch = Hp * 4 + chunk * 3 * Hp * 4
    vmem_limit = int(2 * (resident + 2 * per_chunk + scratch)) + (4 << 20)
    vmem_limit = min(vmem_limit, 100 << 20)

    grid_spec = pltpu.PrefetchScalarGridSpec(
        num_scalar_prefetch=0,
        grid=(n_chunks,),
        in_specs=[
            pl.BlockSpec((chunk, Ip), lambda i: (i, 0)),      # x chunk
            pl.BlockSpec((Ip, 3 * Hp), lambda i: (0, 0)),     # fused W_x
            pl.BlockSpec((1, 3 * Hp), lambda i: (0, 0)),      # fused gate bias
            pl.BlockSpec((Hp, 2 * Hp), lambda i: (0, 0)),     # fused [Wu_h|Wr_h]
            pl.BlockSpec((Hp, Hp), lambda i: (0, 0)),         # Wc_h
            pl.BlockSpec((Hp, Op), lambda i: (0, 0)),         # W_y
            pl.BlockSpec((1, Op), lambda i: (0, 0)),          # b_y
        ],
        out_specs=(
            pl.BlockSpec((chunk, Op), lambda i: (i, 0)),      # y chunk
            pl.BlockSpec((chunk, Hp), lambda i: (i, 0)),      # h chunk
        ),
        scratch_shapes=[
            pltpu.VMEM((1, Hp), jnp.float32),                 # carried hidden
            pltpu.VMEM((chunk, 3 * Hp), jnp.float32),         # chunk x-proj
        ],
    )

    y2d, h2d = pl.pallas_call(
        functools.partial(_gru_kernel, chunk=chunk, hidden_size=hidden_size,
                          approx_gates=not precise),
        out_shape=(
            jax.ShapeDtypeStruct((Sp, Op), jnp.float32),
            jax.ShapeDtypeStruct((Sp, Hp), jnp.float32),
        ),
        grid_spec=grid_spec,
        compiler_params=pltpu.CompilerParams(
            dimension_semantics=("arbitrary",),   # serial recurrence over S
            vmem_limit_bytes=vmem_limit),
    )(x2d, w_x, b_urc, w_urh, wch_p, wy_p, by_p)

    outputs = y2d[:seq_len, :output_size].reshape(seq_len, output_size, 1)
    hidden_states = h2d[:seq_len, :hidden_size].reshape(seq_len, hidden_size, 1)
    return outputs, hidden_states


def init_params(key, input_size, hidden_size, output_size):
    ks = jax.random.split(key, 4)
    fan_in = hidden_size + input_size
    fan_out = hidden_size
    bound = (6.0 / (fan_in + fan_out)) ** 0.5
    W_u = jax.random.uniform(ks[0], (hidden_size, fan_in), jnp.float32, -bound, bound)
    W_r = jax.random.uniform(ks[1], (hidden_size, fan_in), jnp.float32, -bound, bound)
    W_c = jax.random.uniform(ks[2], (hidden_size, fan_in), jnp.float32, -bound, bound)
    W_y = jax.random.normal(ks[3], (output_size, hidden_size), jnp.float32) * 0.01
    b_u = jnp.zeros((hidden_size, 1), jnp.float32)
    b_r = jnp.zeros((hidden_size, 1), jnp.float32)
    b_c = jnp.zeros((hidden_size, 1), jnp.float32)
    b_y = jnp.zeros((output_size, 1), jnp.float32)
    return (W_u, b_u, W_r, b_r, W_c, b_c, W_y, b_y)


def gru_reference(X, params):
    """Pure-JAX reference mirroring the PyTorch forward (dropout in eval mode)."""
    W_u, b_u, W_r, b_r, W_c, b_c, W_y, b_y = params
    hidden_size = W_u.shape[0]
    h_t = jnp.zeros((hidden_size, 1), jnp.float32)
    outputs, hiddens = [], []
    for x_t in X:
        concat = jnp.concatenate((h_t, x_t), axis=0)
        u_t = jax.nn.sigmoid(W_u @ concat + b_u)
        r_t = jax.nn.sigmoid(W_r @ concat + b_r)
        h_cand = jnp.tanh(W_c @ jnp.concatenate((r_t * h_t, x_t), axis=0) + b_c)
        h_t = u_t * h_cand + (1.0 - u_t) * h_t
        hiddens.append(h_t)
        outputs.append(W_y @ h_t + b_y)
    return jnp.stack(outputs, axis=0), jnp.stack(hiddens, axis=0)


if __name__ == "__main__":
    seq_len, input_size, hidden_size, output_size = 8, 16, 32, 8

    key = jax.random.PRNGKey(0)
    k_param, k_x = jax.random.split(key)
    params = init_params(k_param, input_size, hidden_size, output_size)
    X = jax.random.normal(k_x, (seq_len, input_size, 1), jnp.float32)

    ref_out, ref_hid = gru_reference(X, params)

    # Precise path: f32 projections + exact sigmoid (tight tolerance).
    out_p, hid_p = jax.block_until_ready(
        jax.jit(functools.partial(gru_forward, precise=True))(X, params))
    assert out_p.shape == (seq_len, output_size, 1)
    assert hid_p.shape == (seq_len, hidden_size, 1)
    assert jnp.allclose(out_p, ref_out, atol=1e-5, rtol=1e-5)
    assert jnp.allclose(hid_p, ref_hid, atol=1e-5, rtol=1e-5)

    # Fast path (default): bf16 MXU projections + EUP approx-recip sigmoid.
    out_f, hid_f = jax.block_until_ready(jax.jit(gru_forward)(X, params))
    assert out_f.shape == (seq_len, output_size, 1)
    assert hid_f.shape == (seq_len, hidden_size, 1)
    assert jnp.allclose(out_f, ref_out, atol=1e-1, rtol=1e-1)
    assert jnp.allclose(hid_f, ref_hid, atol=1e-1, rtol=1e-1)

    print("KERNEL_OK")
</pallas_src>

<mosaic_0001>
module attributes {stable_mosaic.version = 11 : i64} {
  func.func @_gru_kernel(%arg0: i32, %arg1: memref<8x128xf32, #tpu.memory_space<vmem>>, %arg2: memref<128x384xf32, #tpu.memory_space<vmem>>, %arg3: memref<1x384xf32, #tpu.memory_space<vmem>>, %arg4: memref<128x256xf32, #tpu.memory_space<vmem>>, %arg5: memref<128x128xf32, #tpu.memory_space<vmem>>, %arg6: memref<128x128xf32, #tpu.memory_space<vmem>>, %arg7: memref<1x128xf32, #tpu.memory_space<vmem>>, %arg8: memref<8x128xf32, #tpu.memory_space<vmem>>, %arg9: memref<8x128xf32, #tpu.memory_space<vmem>>, %arg10: memref<1x128xf32, #tpu.memory_space<vmem>>, %arg11: memref<8x384xf32, #tpu.memory_space<vmem>>) attributes {dimension_semantics = [#tpu.dimension_semantics<arbitrary>], iteration_bounds = array<i64: 1>, scalar_prefetch = 0 : i64, scratch_operands = 2 : i64, tpu.core_type = #tpu.core_type<tc>, window_params = [{transform_indices = @transform_0, window_bounds = array<i64: 8, 128>}, {pipeline_mode = #tpu.pipeline_mode<synchronous>, transform_indices = @transform_1, window_bounds = array<i64: 128, 384>}, {pipeline_mode = #tpu.pipeline_mode<synchronous>, transform_indices = @transform_2, window_bounds = array<i64: 1, 384>}, {pipeline_mode = #tpu.pipeline_mode<synchronous>, transform_indices = @transform_3, window_bounds = array<i64: 128, 256>}, {pipeline_mode = #tpu.pipeline_mode<synchronous>, transform_indices = @transform_4, window_bounds = array<i64: 128, 128>}, {pipeline_mode = #tpu.pipeline_mode<synchronous>, transform_indices = @transform_5, window_bounds = array<i64: 128, 128>}, {pipeline_mode = #tpu.pipeline_mode<synchronous>, transform_indices = @transform_6, window_bounds = array<i64: 1, 128>}, {transform_indices = @transform_7, window_bounds = array<i64: 8, 128>}, {transform_indices = @transform_8, window_bounds = array<i64: 8, 128>}]} {
    %c0_i32 = arith.constant 0 : i32
    %0 = arith.cmpi eq, %arg0, %c0_i32 : i32
    %1 = arith.extui %0 : i1 to i32
    %c0_i32_0 = arith.constant 0 : i32
    %2 = arith.cmpi ne, %1, %c0_i32_0 : i32
    scf.if %2 {
      %cst_89 = arith.constant 0.000000e+00 : f32
      %221 = vector.broadcast %cst_89 : f32 to vector<1x128xf32>
      %c0_90 = arith.constant 0 : index
      %c0_91 = arith.constant 0 : index
      %222 = vector.load %arg10[%c0_90, %c0_91] : memref<1x128xf32, #tpu.memory_space<vmem>>, vector<1x128xf32>
      tpu.vector_store %arg10[%c0_90, %c0_91], %221 {strides = array<i32>} : memref<1x128xf32, #tpu.memory_space<vmem>>, vector<1x128xf32>,
    } else {
    }
    %c0 = arith.constant 0 : index
    %c0_1 = arith.constant 0 : index
    %3 = vector.load %arg1[%c0, %c0_1] : memref<8x128xf32, #tpu.memory_space<vmem>>, vector<8x128xf32>
    %c0_2 = arith.constant 0 : index
    %c0_3 = arith.constant 0 : index
    %4 = vector.load %arg2[%c0_2, %c0_3] : memref<128x384xf32, #tpu.memory_space<vmem>>, vector<128x384xf32>
    %cst = arith.constant dense<0.000000e+00> : vector<8x384xf32>
    %5 = tpu.matmul %3, %4, %cst {dimension_numbers = #tpu.dot_dimension_numbers<[1], [0], [0], [1], [0, 0, 1, 1], [], []>} : vector<8x128xf32>, vector<128x384xf32>, vector<8x384xf32> -> vector<8x384xf32>
    %c0_4 = arith.constant 0 : index
    %c0_5 = arith.constant 0 : index
    %6 = vector.load %arg3[%c0_4, %c0_5] : memref<1x384xf32, #tpu.memory_space<vmem>>, vector<1x384xf32>
    %7 = vector.broadcast %6 : vector<1x384xf32> to vector<8x384xf32>
    %8 = arith.addf %5, %7 : vector<8x384xf32>
    %c0_6 = arith.constant 0 : index
    %c0_7 = arith.constant 0 : index
    %9 = vector.load %arg11[%c0_6, %c0_7] : memref<8x384xf32, #tpu.memory_space<vmem>>, vector<8x384xf32>
    tpu.vector_store %arg11[%c0_6, %c0_7], %8 {strides = array<i32>} : memref<8x384xf32, #tpu.memory_space<vmem>>, vector<8x384xf32>,
    %10 = tpu.iota {dimensions = array<i32: 1>} : vector<1x128xi32>
    %c32_i32 = arith.constant 32 : i32
    %11 = vector.broadcast %c32_i32 : i32 to vector<1x128xi32>
    %12 = arith.cmpi slt, %10, %11 : vector<1x128xi32>
    %13 = arith.extui %12 : vector<1x128xi1> to vector<1x128xi32>
    %14 = arith.sitofp %13 : vector<1x128xi32> to vector<1x128xf32>
    %c0_8 = arith.constant 0 : index
    %c0_9 = arith.constant 0 : index
    %15 = vector.load %arg10[%c0_8, %c0_9] : memref<1x128xf32, #tpu.memory_space<vmem>>, vector<1x128xf32>
    %c0_i32_10 = arith.constant 0 : i32
    %c8_i32 = arith.constant 8 : i32
    %16 = arith.muli %c0_i32_10, %c8_i32 : i32
    %17 = tpu.assume_multiple %16, 8 : i32
    %c0_i32_11 = arith.constant 0 : i32
    %18 = arith.addi %17, %c0_i32_11 : i32
    %19 = arith.index_cast %18 : i32 to index
    %c0_12 = arith.constant 0 : index
    %20 = vector.load %arg11[%19, %c0_12] : memref<8x384xf32, #tpu.memory_space<vmem>>, vector<1x384xf32>
    %c0_13 = arith.constant 0 : index
    %c0_14 = arith.constant 0 : index
    %21 = vector.load %arg4[%c0_13, %c0_14] : memref<128x256xf32, #tpu.memory_space<vmem>>, vector<128x256xf32>
    %cst_15 = arith.constant dense<0.000000e+00> : vector<1x256xf32>
    %22 = tpu.matmul %15, %21, %cst_15 {dimension_numbers = #tpu.dot_dimension_numbers<[1], [0], [0], [1], [0, 0, 1, 1], [], []>} : vector<1x128xf32>, vector<128x256xf32>, vector<1x256xf32> -> vector<1x256xf32>
    %23 = vector.extract_strided_slice %20 {offsets = [0, 0], sizes = [1, 256], strides = [1, 1]} : vector<1x384xf32> to vector<1x256xf32>
    %24 = arith.addf %22, %23 : vector<1x256xf32>
    %25 = arith.negf %24 : vector<1x256xf32>
    %26 = math.exp %25 : vector<1x256xf32>
    %cst_16 = arith.constant 1.000000e+00 : f32
    %27 = vector.broadcast %cst_16 : f32 to vector<1x256xf32>
    %28 = arith.addf %27, %26 : vector<1x256xf32>
    %29 = arith.divf %27, %28 : vector<1x256xf32>
    %30 = vector.extract_strided_slice %29 {offsets = [0, 0], sizes = [1, 128], strides = [1, 1]} : vector<1x256xf32> to vector<1x128xf32>
    %31 = vector.extract_strided_slice %29 {offsets = [0, 128], sizes = [1, 128], strides = [1, 1]} : vector<1x256xf32> to vector<1x128xf32>
    %32 = arith.mulf %31, %15 : vector<1x128xf32>
    %c0_17 = arith.constant 0 : index
    %c0_18 = arith.constant 0 : index
    %33 = vector.load %arg5[%c0_17, %c0_18] : memref<128x128xf32, #tpu.memory_space<vmem>>, vector<128x128xf32>
    %cst_19 = arith.constant dense<0.000000e+00> : vector<1x128xf32>
    %34 = tpu.matmul %32, %33, %cst_19 {dimension_numbers = #tpu.dot_dimension_numbers<[1], [0], [0], [1], [0, 0, 1, 1], [], []>} : vector<1x128xf32>, vector<128x128xf32>, vector<1x128xf32> -> vector<1x128xf32>
    %35 = vector.extract_strided_slice %20 {offsets = [0, 256], sizes = [1, 128], strides = [1, 1]} : vector<1x384xf32> to vector<1x128xf32>
    %36 = arith.addf %34, %35 : vector<1x128xf32>
    %37 = math.tanh %36 : vector<1x128xf32>
    %38 = arith.subf %37, %15 : vector<1x128xf32>
    %39 = arith.mulf %30, %38 : vector<1x128xf32>
    %40 = arith.addf %15, %39 : vector<1x128xf32>
    %41 = arith.mulf %40, %14 : vector<1x128xf32>
    %c1_i32 = arith.constant 1 : i32
    %42 = arith.addi %17, %c1_i32 : i32
    %43 = arith.index_cast %42 : i32 to index
    %c0_20 = arith.constant 0 : index
    %44 = vector.load %arg11[%43, %c0_20] : memref<8x384xf32, #tpu.memory_space<vmem>>, vector<1x384xf32>
    %c0_21 = arith.constant 0 : index
    %c0_22 = arith.constant 0 : index
    %45 = vector.load %arg4[%c0_21, %c0_22] : memref<128x256xf32, #tpu.memory_space<vmem>>, vector<128x256xf32>
    %cst_23 = arith.constant dense<0.000000e+00> : vector<1x256xf32>
    %46 = tpu.matmul %41, %45, %cst_23 {dimension_numbers = #tpu.dot_dimension_numbers<[1], [0], [0], [1], [0, 0, 1, 1], [], []>} : vector<1x128xf32>, vector<128x256xf32>, vector<1x256xf32> -> vector<1x256xf32>
    %47 = vector.extract_strided_slice %44 {offsets = [0, 0], sizes = [1, 256], strides = [1, 1]} : vector<1x384xf32> to vector<1x256xf32>
    %48 = arith.addf %46, %47 : vector<1x256xf32>
    %49 = arith.negf %48 : vector<1x256xf32>
    %50 = math.exp %49 : vector<1x256xf32>
    %cst_24 = arith.constant 1.000000e+00 : f32
    %51 = vector.broadcast %cst_24 : f32 to vector<1x256xf32>
    %52 = arith.addf %51, %50 : vector<1x256xf32>
    %53 = arith.divf %51, %52 : vector<1x256xf32>
    %54 = vector.extract_strided_slice %53 {offsets = [0, 0], sizes = [1, 128], strides = [1, 1]} : vector<1x256xf32> to vector<1x128xf32>
    %55 = vector.extract_strided_slice %53 {offsets = [0, 128], sizes = [1, 128], strides = [1, 1]} : vector<1x256xf32> to vector<1x128xf32>
    %56 = arith.mulf %55, %41 : vector<1x128xf32>
    %c0_25 = arith.constant 0 : index
    %c0_26 = arith.constant 0 : index
    %57 = vector.load %arg5[%c0_25, %c0_26] : memref<128x128xf32, #tpu.memory_space<vmem>>, vector<128x128xf32>
    %cst_27 = arith.constant dense<0.000000e+00> : vector<1x128xf32>
    %58 = tpu.matmul %56, %57, %cst_27 {dimension_numbers = #tpu.dot_dimension_numbers<[1], [0], [0], [1], [0, 0, 1, 1], [], []>} : vector<1x128xf32>, vector<128x128xf32>, vector<1x128xf32> -> vector<1x128xf32>
    %59 = vector.extract_strided_slice %44 {offsets = [0, 256], sizes = [1, 128], strides = [1, 1]} : vector<1x384xf32> to vector<1x128xf32>
    %60 = arith.addf %58, %59 : vector<1x128xf32>
    %61 = math.tanh %60 : vector<1x128xf32>
    %62 = arith.subf %61, %41 : vector<1x128xf32>
    %63 = arith.mulf %54, %62 : vector<1x128xf32>
    %64 = arith.addf %41, %63 : vector<1x128xf32>
    %65 = arith.mulf %64, %14 : vector<1x128xf32>
    %c2_i32 = arith.constant 2 : i32
    %66 = arith.addi %17, %c2_i32 : i32
    %67 = arith.index_cast %66 : i32 to index
    %c0_28 = arith.constant 0 : index
    %68 = vector.load %arg11[%67, %c0_28] : memref<8x384xf32, #tpu.memory_space<vmem>>, vector<1x384xf32>
    %c0_29 = arith.constant 0 : index
    %c0_30 = arith.constant 0 : index
    %69 = vector.load %arg4[%c0_29, %c0_30] : memref<128x256xf32, #tpu.memory_space<vmem>>, vector<128x256xf32>
    %cst_31 = arith.constant dense<0.000000e+00> : vector<1x256xf32>
    %70 = tpu.matmul %65, %69, %cst_31 {dimension_numbers = #tpu.dot_dimension_numbers<[1], [0], [0], [1], [0, 0, 1, 1], [], []>} : vector<1x128xf32>, vector<128x256xf32>, vector<1x256xf32> -> vector<1x256xf32>
    %71 = vector.extract_strided_slice %68 {offsets = [0, 0], sizes = [1, 256], strides = [1, 1]} : vector<1x384xf32> to vector<1x256xf32>
    %72 = arith.addf %70, %71 : vector<1x256xf32>
    %73 = arith.negf %72 : vector<1x256xf32>
    %74 = math.exp %73 : vector<1x256xf32>
    %cst_32 = arith.constant 1.000000e+00 : f32
    %75 = vector.broadcast %cst_32 : f32 to vector<1x256xf32>
    %76 = arith.addf %75, %74 : vector<1x256xf32>
    %77 = arith.divf %75, %76 : vector<1x256xf32>
    %78 = vector.extract_strided_slice %77 {offsets = [0, 0], sizes = [1, 128], strides = [1, 1]} : vector<1x256xf32> to vector<1x128xf32>
    %79 = vector.extract_strided_slice %77 {offsets = [0, 128], sizes = [1, 128], strides = [1, 1]} : vector<1x256xf32> to vector<1x128xf32>
    %80 = arith.mulf %79, %65 : vector<1x128xf32>
    %c0_33 = arith.constant 0 : index
    %c0_34 = arith.constant 0 : index
    %81 = vector.load %arg5[%c0_33, %c0_34] : memref<128x128xf32, #tpu.memory_space<vmem>>, vector<128x128xf32>
    %cst_35 = arith.constant dense<0.000000e+00> : vector<1x128xf32>
    %82 = tpu.matmul %80, %81, %cst_35 {dimension_numbers = #tpu.dot_dimension_numbers<[1], [0], [0], [1], [0, 0, 1, 1], [], []>} : vector<1x128xf32>, vector<128x128xf32>, vector<1x128xf32> -> vector<1x128xf32>
    %83 = vector.extract_strided_slice %68 {offsets = [0, 256], sizes = [1, 128], strides = [1, 1]} : vector<1x384xf32> to vector<1x128xf32>
    %84 = arith.addf %82, %83 : vector<1x128xf32>
    %85 = math.tanh %84 : vector<1x128xf32>
    %86 = arith.subf %85, %65 : vector<1x128xf32>
    %87 = arith.mulf %78, %86 : vector<1x128xf32>
    %88 = arith.addf %65, %87 : vector<1x128xf32>
    %89 = arith.mulf %88, %14 : vector<1x128xf32>
    %c3_i32 = arith.constant 3 : i32
    %90 = arith.addi %17, %c3_i32 : i32
    %91 = arith.index_cast %90 : i32 to index
    %c0_36 = arith.constant 0 : index
    %92 = vector.load %arg11[%91, %c0_36] : memref<8x384xf32, #tpu.memory_space<vmem>>, vector<1x384xf32>
    %c0_37 = arith.constant 0 : index
    %c0_38 = arith.constant 0 : index
    %93 = vector.load %arg4[%c0_37, %c0_38] : memref<128x256xf32, #tpu.memory_space<vmem>>, vector<128x256xf32>
    %cst_39 = arith.constant dense<0.000000e+00> : vector<1x256xf32>
    %94 = tpu.matmul %89, %93, %cst_39 {dimension_numbers = #tpu.dot_dimension_numbers<[1], [0], [0], [1], [0, 0, 1, 1], [], []>} : vector<1x128xf32>, vector<128x256xf32>, vector<1x256xf32> -> vector<1x256xf32>
    %95 = vector.extract_strided_slice %92 {offsets = [0, 0], sizes = [1, 256], strides = [1, 1]} : vector<1x384xf32> to vector<1x256xf32>
    %96 = arith.addf %94, %95 : vector<1x256xf32>
    %97 = arith.negf %96 : vector<1x256xf32>
    %98 = math.exp %97 : vector<1x256xf32>
    %cst_40 = arith.constant 1.000000e+00 : f32
    %99 = vector.broadcast %cst_40 : f32 to vector<1x256xf32>
    %100 = arith.addf %99, %98 : vector<1x256xf32>
    %101 = arith.divf %99, %100 : vector<1x256xf32>
    %102 = vector.extract_strided_slice %101 {offsets = [0, 0], sizes = [1, 128], strides = [1, 1]} : vector<1x256xf32> to vector<1x128xf32>
    %103 = vector.extract_strided_slice %101 {offsets = [0, 128], sizes = [1, 128], strides = [1, 1]} : vector<1x256xf32> to vector<1x128xf32>
    %104 = arith.mulf %103, %89 : vector<1x128xf32>
    %c0_41 = arith.constant 0 : index
    %c0_42 = arith.constant 0 : index
    %105 = vector.load %arg5[%c0_41, %c0_42] : memref<128x128xf32, #tpu.memory_space<vmem>>, vector<128x128xf32>
    %cst_43 = arith.constant dense<0.000000e+00> : vector<1x128xf32>
    %106 = tpu.matmul %104, %105, %cst_43 {dimension_numbers = #tpu.dot_dimension_numbers<[1], [0], [0], [1], [0, 0, 1, 1], [], []>} : vector<1x128xf32>, vector<128x128xf32>, vector<1x128xf32> -> vector<1x128xf32>
    %107 = vector.extract_strided_slice %92 {offsets = [0, 256], sizes = [1, 128], strides = [1, 1]} : vector<1x384xf32> to vector<1x128xf32>
    %108 = arith.addf %106, %107 : vector<1x128xf32>
    %109 = math.tanh %108 : vector<1x128xf32>
    %110 = arith.subf %109, %89 : vector<1x128xf32>
    %111 = arith.mulf %102, %110 : vector<1x128xf32>
    %112 = arith.addf %89, %111 : vector<1x128xf32>
    %113 = arith.mulf %112, %14 : vector<1x128xf32>
    %c4_i32 = arith.constant 4 : i32
    %114 = arith.addi %17, %c4_i32 : i32
    %115 = arith.index_cast %114 : i32 to index
    %c0_44 = arith.constant 0 : index
    %116 = vector.load %arg11[%115, %c0_44] : memref<8x384xf32, #tpu.memory_space<vmem>>, vector<1x384xf32>
    %c0_45 = arith.constant 0 : index
    %c0_46 = arith.constant 0 : index
    %117 = vector.load %arg4[%c0_45, %c0_46] : memref<128x256xf32, #tpu.memory_space<vmem>>, vector<128x256xf32>
    %cst_47 = arith.constant dense<0.000000e+00> : vector<1x256xf32>
    %118 = tpu.matmul %113, %117, %cst_47 {dimension_numbers = #tpu.dot_dimension_numbers<[1], [0], [0], [1], [0, 0, 1, 1], [], []>} : vector<1x128xf32>, vector<128x256xf32>, vector<1x256xf32> -> vector<1x256xf32>
    %119 = vector.extract_strided_slice %116 {offsets = [0, 0], sizes = [1, 256], strides = [1, 1]} : vector<1x384xf32> to vector<1x256xf32>
    %120 = arith.addf %118, %119 : vector<1x256xf32>
    %121 = arith.negf %120 : vector<1x256xf32>
    %122 = math.exp %121 : vector<1x256xf32>
    %cst_48 = arith.constant 1.000000e+00 : f32
    %123 = vector.broadcast %cst_48 : f32 to vector<1x256xf32>
    %124 = arith.addf %123, %122 : vector<1x256xf32>
    %125 = arith.divf %123, %124 : vector<1x256xf32>
    %126 = vector.extract_strided_slice %125 {offsets = [0, 0], sizes = [1, 128], strides = [1, 1]} : vector<1x256xf32> to vector<1x128xf32>
    %127 = vector.extract_strided_slice %125 {offsets = [0, 128], sizes = [1, 128], strides = [1, 1]} : vector<1x256xf32> to vector<1x128xf32>
    %128 = arith.mulf %127, %113 : vector<1x128xf32>
    %c0_49 = arith.constant 0 : index
    %c0_50 = arith.constant 0 : index
    %129 = vector.load %arg5[%c0_49, %c0_50] : memref<128x128xf32, #tpu.memory_space<vmem>>, vector<128x128xf32>
    %cst_51 = arith.constant dense<0.000000e+00> : vector<1x128xf32>
    %130 = tpu.matmul %128, %129, %cst_51 {dimension_numbers = #tpu.dot_dimension_numbers<[1], [0], [0], [1], [0, 0, 1, 1], [], []>} : vector<1x128xf32>, vector<128x128xf32>, vector<1x128xf32> -> vector<1x128xf32>
    %131 = vector.extract_strided_slice %116 {offsets = [0, 256], sizes = [1, 128], strides = [1, 1]} : vector<1x384xf32> to vector<1x128xf32>
    %132 = arith.addf %130, %131 : vector<1x128xf32>
    %133 = math.tanh %132 : vector<1x128xf32>
    %134 = arith.subf %133, %113 : vector<1x128xf32>
    %135 = arith.mulf %126, %134 : vector<1x128xf32>
    %136 = arith.addf %113, %135 : vector<1x128xf32>
    %137 = arith.mulf %136, %14 : vector<1x128xf32>
    %c5_i32 = arith.constant 5 : i32
    %138 = arith.addi %17, %c5_i32 : i32
    %139 = arith.index_cast %138 : i32 to index
    %c0_52 = arith.constant 0 : index
    %140 = vector.load %arg11[%139, %c0_52] : memref<8x384xf32, #tpu.memory_space<vmem>>, vector<1x384xf32>
    %c0_53 = arith.constant 0 : index
    %c0_54 = arith.constant 0 : index
    %141 = vector.load %arg4[%c0_53, %c0_54] : memref<128x256xf32, #tpu.memory_space<vmem>>, vector<128x256xf32>
    %cst_55 = arith.constant dense<0.000000e+00> : vector<1x256xf32>
    %142 = tpu.matmul %137, %141, %cst_55 {dimension_numbers = #tpu.dot_dimension_numbers<[1], [0], [0], [1], [0, 0, 1, 1], [], []>} : vector<1x128xf32>, vector<128x256xf32>, vector<1x256xf32> -> vector<1x256xf32>
    %143 = vector.extract_strided_slice %140 {offsets = [0, 0], sizes = [1, 256], strides = [1, 1]} : vector<1x384xf32> to vector<1x256xf32>
    %144 = arith.addf %142, %143 : vector<1x256xf32>
    %145 = arith.negf %144 : vector<1x256xf32>
    %146 = math.exp %145 : vector<1x256xf32>
    %cst_56 = arith.constant 1.000000e+00 : f32
    %147 = vector.broadcast %cst_56 : f32 to vector<1x256xf32>
    %148 = arith.addf %147, %146 : vector<1x256xf32>
    %149 = arith.divf %147, %148 : vector<1x256xf32>
    %150 = vector.extract_strided_slice %149 {offsets = [0, 0], sizes = [1, 128], strides = [1, 1]} : vector<1x256xf32> to vector<1x128xf32>
    %151 = vector.extract_strided_slice %149 {offsets = [0, 128], sizes = [1, 128], strides = [1, 1]} : vector<1x256xf32> to vector<1x128xf32>
    %152 = arith.mulf %151, %137 : vector<1x128xf32>
    %c0_57 = arith.constant 0 : index
    %c0_58 = arith.constant 0 : index
    %153 = vector.load %arg5[%c0_57, %c0_58] : memref<128x128xf32, #tpu.memory_space<vmem>>, vector<128x128xf32>
    %cst_59 = arith.constant dense<0.000000e+00> : vector<1x128xf32>
    %154 = tpu.matmul %152, %153, %cst_59 {dimension_numbers = #tpu.dot_dimension_numbers<[1], [0], [0], [1], [0, 0, 1, 1], [], []>} : vector<1x128xf32>, vector<128x128xf32>, vector<1x128xf32> -> vector<1x128xf32>
    %155 = vector.extract_strided_slice %140 {offsets = [0, 256], sizes = [1, 128], strides = [1, 1]} : vector<1x384xf32> to vector<1x128xf32>
    %156 = arith.addf %154, %155 : vector<1x128xf32>
    %157 = math.tanh %156 : vector<1x128xf32>
    %158 = arith.subf %157, %137 : vector<1x128xf32>
    %159 = arith.mulf %150, %158 : vector<1x128xf32>
    %160 = arith.addf %137, %159 : vector<1x128xf32>
    %161 = arith.mulf %160, %14 : vector<1x128xf32>
    %c6_i32 = arith.constant 6 : i32
    %162 = arith.addi %17, %c6_i32 : i32
    %163 = arith.index_cast %162 : i32 to index
    %c0_60 = arith.constant 0 : index
    %164 = vector.load %arg11[%163, %c0_60] : memref<8x384xf32, #tpu.memory_space<vmem>>, vector<1x384xf32>
    %c0_61 = arith.constant 0 : index
    %c0_62 = arith.constant 0 : index
    %165 = vector.load %arg4[%c0_61, %c0_62] : memref<128x256xf32, #tpu.memory_space<vmem>>, vector<128x256xf32>
    %cst_63 = arith.constant dense<0.000000e+00> : vector<1x256xf32>
    %166 = tpu.matmul %161, %165, %cst_63 {dimension_numbers = #tpu.dot_dimension_numbers<[1], [0], [0], [1], [0, 0, 1, 1], [], []>} : vector<1x128xf32>, vector<128x256xf32>, vector<1x256xf32> -> vector<1x256xf32>
    %167 = vector.extract_strided_slice %164 {offsets = [0, 0], sizes = [1, 256], strides = [1, 1]} : vector<1x384xf32> to vector<1x256xf32>
    %168 = arith.addf %166, %167 : vector<1x256xf32>
    %169 = arith.negf %168 : vector<1x256xf32>
    %170 = math.exp %169 : vector<1x256xf32>
    %cst_64 = arith.constant 1.000000e+00 : f32
    %171 = vector.broadcast %cst_64 : f32 to vector<1x256xf32>
    %172 = arith.addf %171, %170 : vector<1x256xf32>
    %173 = arith.divf %171, %172 : vector<1x256xf32>
    %174 = vector.extract_strided_slice %173 {offsets = [0, 0], sizes = [1, 128], strides = [1, 1]} : vector<1x256xf32> to vector<1x128xf32>
    %175 = vector.extract_strided_slice %173 {offsets = [0, 128], sizes = [1, 128], strides = [1, 1]} : vector<1x256xf32> to vector<1x128xf32>
    %176 = arith.mulf %175, %161 : vector<1x128xf32>
    %c0_65 = arith.constant 0 : index
    %c0_66 = arith.constant 0 : index
    %177 = vector.load %arg5[%c0_65, %c0_66] : memref<128x128xf32, #tpu.memory_space<vmem>>, vector<128x128xf32>
    %cst_67 = arith.constant dense<0.000000e+00> : vector<1x128xf32>
    %178 = tpu.matmul %176, %177, %cst_67 {dimension_numbers = #tpu.dot_dimension_numbers<[1], [0], [0], [1], [0, 0, 1, 1], [], []>} : vector<1x128xf32>, vector<128x128xf32>, vector<1x128xf32> -> vector<1x128xf32>
    %179 = vector.extract_strided_slice %164 {offsets = [0, 256], sizes = [1, 128], strides = [1, 1]} : vector<1x384xf32> to vector<1x128xf32>
    %180 = arith.addf %178, %179 : vector<1x128xf32>
    %181 = math.tanh %180 : vector<1x128xf32>
    %182 = arith.subf %181, %161 : vector<1x128xf32>
    %183 = arith.mulf %174, %182 : vector<1x128xf32>
    %184 = arith.addf %161, %183 : vector<1x128xf32>
    %185 = arith.mulf %184, %14 : vector<1x128xf32>
    %c7_i32 = arith.constant 7 : i32
    %186 = arith.addi %17, %c7_i32 : i32
    %187 = arith.index_cast %186 : i32 to index
    %c0_68 = arith.constant 0 : index
    %188 = vector.load %arg11[%187, %c0_68] : memref<8x384xf32, #tpu.memory_space<vmem>>, vector<1x384xf32>
    %c0_69 = arith.constant 0 : index
    %c0_70 = arith.constant 0 : index
    %189 = vector.load %arg4[%c0_69, %c0_70] : memref<128x256xf32, #tpu.memory_space<vmem>>, vector<128x256xf32>
    %cst_71 = arith.constant dense<0.000000e+00> : vector<1x256xf32>
    %190 = tpu.matmul %185, %189, %cst_71 {dimension_numbers = #tpu.dot_dimension_numbers<[1], [0], [0], [1], [0, 0, 1, 1], [], []>} : vector<1x128xf32>, vector<128x256xf32>, vector<1x256xf32> -> vector<1x256xf32>
    %191 = vector.extract_strided_slice %188 {offsets = [0, 0], sizes = [1, 256], strides = [1, 1]} : vector<1x384xf32> to vector<1x256xf32>
    %192 = arith.addf %190, %191 : vector<1x256xf32>
    %193 = arith.negf %192 : vector<1x256xf32>
    %194 = math.exp %193 : vector<1x256xf32>
    %cst_72 = arith.constant 1.000000e+00 : f32
    %195 = vector.broadcast %cst_72 : f32 to vector<1x256xf32>
    %196 = arith.addf %195, %194 : vector<1x256xf32>
    %197 = arith.divf %195, %196 : vector<1x256xf32>
    %198 = vector.extract_strided_slice %197 {offsets = [0, 0], sizes = [1, 128], strides = [1, 1]} : vector<1x256xf32> to vector<1x128xf32>
    %199 = vector.extract_strided_slice %197 {offsets = [0, 128], sizes = [1, 128], strides = [1, 1]} : vector<1x256xf32> to vector<1x128xf32>
    %200 = arith.mulf %199, %185 : vector<1x128xf32>
    %c0_73 = arith.constant 0 : index
    %c0_74 = arith.constant 0 : index
    %201 = vector.load %arg5[%c0_73, %c0_74] : memref<128x128xf32, #tpu.memory_space<vmem>>, vector<128x128xf32>
    %cst_75 = arith.constant dense<0.000000e+00> : vector<1x128xf32>
    %202 = tpu.matmul %200, %201, %cst_75 {dimension_numbers = #tpu.dot_dimension_numbers<[1], [0], [0], [1], [0, 0, 1, 1], [], []>} : vector<1x128xf32>, vector<128x128xf32>, vector<1x128xf32> -> vector<1x128xf32>
    %203 = vector.extract_strided_slice %188 {offsets = [0, 256], sizes = [1, 128], strides = [1, 1]} : vector<1x384xf32> to vector<1x128xf32>
    %204 = arith.addf %202, %203 : vector<1x128xf32>
    %205 = math.tanh %204 : vector<1x128xf32>
    %206 = arith.subf %205, %185 : vector<1x128xf32>
    %207 = arith.mulf %198, %206 : vector<1x128xf32>
    %208 = arith.addf %185, %207 : vector<1x128xf32>
    %209 = arith.mulf %208, %14 : vector<1x128xf32>
    %210 = tpu.concatenate %41, %65, %89, %113, %137, %161, %185, %209 in 0 : vector<1x128xf32>, vector<1x128xf32>, vector<1x128xf32>, vector<1x128xf32>, vector<1x128xf32>, vector<1x128xf32>, vector<1x128xf32>, vector<1x128xf32> -> vector<8x128xf32>
    %211 = arith.index_cast %17 : i32 to index
    %c0_76 = arith.constant 0 : index
    %212 = vector.load %arg9[%211, %c0_76] : memref<8x128xf32, #tpu.memory_space<vmem>>, vector<8x128xf32>
    tpu.vector_store %arg9[%211, %c0_76], %210 {strides = array<i32>} : memref<8x128xf32, #tpu.memory_space<vmem>>, vector<8x128xf32>,
    %c1_i32_77 = arith.constant 1 : i32
    %c0_78 = arith.constant 0 : index
    %c0_79 = arith.constant 0 : index
    %213 = vector.load %arg10[%c0_78, %c0_79] : memref<1x128xf32, #tpu.memory_space<vmem>>, vector<1x128xf32>
    tpu.vector_store %arg10[%c0_78, %c0_79], %209 {strides = array<i32>} : memref<1x128xf32, #tpu.memory_space<vmem>>, vector<1x128xf32>,
    %c0_80 = arith.constant 0 : index
    %c0_81 = arith.constant 0 : index
    %214 = vector.load %arg9[%c0_80, %c0_81] : memref<8x128xf32, #tpu.memory_space<vmem>>, vector<8x128xf32>
    %c0_82 = arith.constant 0 : index
    %c0_83 = arith.constant 0 : index
    %215 = vector.load %arg6[%c0_82, %c0_83] : memref<128x128xf32, #tpu.memory_space<vmem>>, vector<128x128xf32>
    %cst_84 = arith.constant dense<0.000000e+00> : vector<8x128xf32>
    %216 = tpu.matmul %214, %215, %cst_84 {dimension_numbers = #tpu.dot_dimension_numbers<[1], [0], [0], [1], [0, 0, 1, 1], [], []>} : vector<8x128xf32>, vector<128x128xf32>, vector<8x128xf32> -> vector<8x128xf32>
    %c0_85 = arith.constant 0 : index
    %c0_86 = arith.constant 0 : index
    %217 = vector.load %arg7[%c0_85, %c0_86] : memref<1x128xf32, #tpu.memory_space<vmem>>, vector<1x128xf32>
    %218 = vector.broadcast %217 : vector<1x128xf32> to vector<8x128xf32>
    %219 = arith.addf %216, %218 : vector<8x128xf32>
    %c0_87 = arith.constant 0 : index
    %c0_88 = arith.constant 0 : index
    %220 = vector.load %arg8[%c0_87, %c0_88] : memref<8x128xf32, #tpu.memory_space<vmem>>, vector<8x128xf32>
    tpu.vector_store %arg8[%c0_87, %c0_88], %219 {strides = array<i32>} : memref<8x128xf32, #tpu.memory_space<vmem>>, vector<8x128xf32>,
    return
  }
  func.func @transform_0(%arg0: i32) -> (i32, i32) {
    %c0_i32 = arith.constant 0 : i32
    %c0_i32_0 = arith.constant 0 : i32
    return %arg0, %c0_i32 : i32, i32
  }
  func.func @transform_1(%arg0: i32) -> (i32, i32) {
    %c0_i32 = arith.constant 0 : i32
    %c0_i32_0 = arith.constant 0 : i32
    %c0_i32_1 = arith.constant 0 : i32
    return %c0_i32, %c0_i32_0 : i32, i32
  }
  func.func @transform_2(%arg0: i32) -> (i32, i32) {
    %c0_i32 = arith.constant 0 : i32
    %c0_i32_0 = arith.constant 0 : i32
    %c0_i32_1 = arith.constant 0 : i32
    return %c0_i32, %c0_i32_0 : i32, i32
  }
  func.func @transform_3(%arg0: i32) -> (i32, i32) {
    %c0_i32 = arith.constant 0 : i32
    %c0_i32_0 = arith.constant 0 : i32
    %c0_i32_1 = arith.constant 0 : i32
    return %c0_i32, %c0_i32_0 : i32, i32
  }
  func.func @transform_4(%arg0: i32) -> (i32, i32) {
    %c0_i32 = arith.constant 0 : i32
    %c0_i32_0 = arith.constant 0 : i32
    %c0_i32_1 = arith.constant 0 : i32
    return %c0_i32, %c0_i32_0 : i32, i32
  }
  func.func @transform_5(%arg0: i32) -> (i32, i32) {
    %c0_i32 = arith.constant 0 : i32
    %c0_i32_0 = arith.constant 0 : i32
    %c0_i32_1 = arith.constant 0 : i32
    return %c0_i32, %c0_i32_0 : i32, i32
  }
  func.func @transform_6(%arg0: i32) -> (i32, i32) {
    %c0_i32 = arith.constant 0 : i32
    %c0_i32_0 = arith.constant 0 : i32
    %c0_i32_1 = arith.constant 0 : i32
    return %c0_i32, %c0_i32_0 : i32, i32
  }
  func.func @transform_7(%arg0: i32) -> (i32, i32) {
    %c0_i32 = arith.constant 0 : i32
    %c0_i32_0 = arith.constant 0 : i32
    return %arg0, %c0_i32 : i32, i32
  }
  func.func @transform_8(%arg0: i32) -> (i32, i32) {
    %c0_i32 = arith.constant 0 : i32
    %c0_i32_0 = arith.constant 0 : i32
    return %arg0, %c0_i32 : i32, i32
  }
}

</mosaic_0001>

<bundles_post_ra>
// kernel: gru_forward.1
= control target key start
LH: loop header
LB: loop body
LE: loop exit
PB: predicated region body
PF: predicated region fallthrough
CT: control target
= control target key end

     0   :  { %14 = vsyncpa [#allocation5], 0  ;;  %v3174_v5 = vmov 0.0|0.0   ;;  %v3175_v8 = vmov 0.0   ;;  %vm3176_vm0 = vmmov 0   ;;  %s4049_s0 = inlined_call_operand.vmem [shape: f32[8,128], index: 0, kind: input, shape index: {}]   ;;  %s4050_s1 = inlined_call_operand.vmem [shape: f32[128,384], index: 1, kind: input, shape index: {}]   ;;  %s4051_s2 = inlined_call_operand.vmem [shape: f32[1,384], index: 2, kind: input, shape index: {}]   ;;  %s4052_s3 = inlined_call_operand.vmem [shape: f32[128,256], index: 3, kind: input, shape index: {}]   ;;  %s4053_s4 = inlined_call_operand.vmem [shape: f32[128,128], index: 4, kind: input, shape index: {}]   ;;  %s4054_s5 = inlined_call_operand.vmem [shape: f32[128,128], index: 5, kind: input, shape index: {}]   ;;  %s4055_s6 = inlined_call_operand.vmem [shape: f32[1,128], index: 6, kind: input, shape index: {}]   ;;  %s4056_s7 = inlined_call_operand.hbm [shape: f32[8,128], index: 7, kind: output, shape index: {0}]   ;;  %s4057_s8 = inlined_call_operand.hbm [shape: f32[8,128], index: 8, kind: output, shape index: {1}]  }
   0x1   :  { %v37_v0 = vld [vmem:[%s4050_s1 + $0x8] sm:$0xff]  ;;  %v40_v1 = vld [vmem:[%s4050_s1 + $0x20] sm:$0xff]  ;;  %v39_v4 = vld [vmem:[%s4050_s1 + $0x18] sm:$0xff]  ;;  %2545 = vmatprep.subr.bf16.mxu1 %v3174_v5  ;;  %165 = vmatprep.mubr.f32.mxu0 %v3175_v8  ;;  %34 = vst [vmem:[#allocation2] sm:$0x1] %v3175_v8 }
   0x2   :  { %v36_v2 = vld [vmem:[%s4050_s1] sm:$0xff]  ;;  %v2513_v3 = vpack.c.bf16 %v40_v1, %v37_v0  ;;  %v38_v6 = vld [vmem:[%s4050_s1 + $0x10] sm:$0xff]  ;;  %v41_v7 = vld [vmem:[%s4050_s1 + $0x28] sm:$0xff]  ;;  %2195 = vmatprep.mubr.msk.f32.mxu1 %vm3176_vm0, %v3175_v8 }
   0x3   :  { %v2515_v9 = vpack.c.bf16 %v39_v4, %v36_v2  ;;  %v2546_v10 = vpack.c.bf16 %v41_v7, %v38_v6  ;;  %v43_v11 = vld [vmem:[%s4050_s1 + $0x38] sm:$0xff]  ;;  %v46_v12 = vld [vmem:[%s4050_s1 + $0x50] sm:$0xff]  ;;  %v45_v15 = vld [vmem:[%s4050_s1 + $0x48] sm:$0xff] }
   0x4   :  { %v42_v13 = vld [vmem:[%s4050_s1 + $0x30] sm:$0xff]  ;;  %2514 = vmatprep.subr.bf16.mxu0 %v2513_v3  ;;  %v2517_v14 = vpack.c.bf16 %v46_v12, %v43_v11  ;;  %v44_v16 = vld [vmem:[%s4050_s1 + $0x40] sm:$0xff]  ;;  %v47_v17 = vld [vmem:[%s4050_s1 + $0x58] sm:$0xff] }
   0x5   :  { %2516 = vmatpush1.bf16.msra.mxu0 %v2515_v9  ;;  %2547 = vmatpush3.bf16.msra.mxu1 %v2546_v10  ;;  %v2519_v18 = vpack.c.bf16 %v45_v15, %v42_v13  ;;  %v2549_v19 = vpack.c.bf16 %v47_v17, %v44_v16  ;;  %v49_v20 = vld [vmem:[%s4050_s1 + $0x68] sm:$0xff]  ;;  %v52_v21 = vld [vmem:[%s4050_s1 + $0x80] sm:$0xff]  ;;  %v51_v24 = vld [vmem:[%s4050_s1 + $0x78] sm:$0xff] }
   0x6   :  { %v48_v22 = vld [vmem:[%s4050_s1 + $0x60] sm:$0xff]  ;;  %2518 = vmatprep.subr.bf16.mxu0 %v2517_v14  ;;  %2548 = vmatprep.subr.bf16.mxu1 %v3174_v5  ;;  %v2521_v23 = vpack.c.bf16 %v52_v21, %v49_v20  ;;  %v50_v25 = vld [vmem:[%s4050_s1 + $0x70] sm:$0xff]  ;;  %v53_v26 = vld [vmem:[%s4050_s1 + $0x88] sm:$0xff] }
   0x7   :  { %v55_v27 = vld [vmem:[%s4050_s1 + $0x98] sm:$0xff]  ;;  %v58_v28 = vld [vmem:[%s4050_s1 + $0xb0] sm:$0xff]  ;;  %v2523_v29 = vpack.c.bf16 %v51_v24, %v48_v22  ;;  %v2552_v30 = vpack.c.bf16 %v53_v26, %v50_v25  ;;  %v57_v33 = vld [vmem:[%s4050_s1 + $0xa8] sm:$0xff] }
   0x8   :  { %v54_v31 = vld [vmem:[%s4050_s1 + $0x90] sm:$0xff]  ;;  %v2525_v32 = vpack.c.bf16 %v58_v28, %v55_v27  ;;  %v56_v34 = vld [vmem:[%s4050_s1 + $0xa0] sm:$0xff]  ;;  %v59_v35 = vld [vmem:[%s4050_s1 + $0xb8] sm:$0xff] }
   0x9   :  { %2520 = vmatpush1.bf16.msra.mxu0 %v2519_v18  ;;  %2550 = vmatpush3.bf16.msra.mxu1 %v2549_v19  ;;  %v61_v36 = vld [vmem:[%s4050_s1 + $0xc8] sm:$0xff]  ;;  %v64_v37 = vld [vmem:[%s4050_s1 + $0xe0] sm:$0xff]  ;;  %v2527_v38 = vpack.c.bf16 %v57_v33, %v54_v31  ;;  %v2555_v39 = vpack.c.bf16 %v59_v35, %v56_v34  ;;  %v63_v42 = vld [vmem:[%s4050_s1 + $0xd8] sm:$0xff] }
   0xa   :  { %2522 = vmatprep.subr.bf16.mxu0 %v2521_v23  ;;  %2551 = vmatprep.subr.bf16.mxu1 %v3174_v5  ;;  %v60_v40 = vld [vmem:[%s4050_s1 + $0xc0] sm:$0xff]  ;;  %v2529_v41 = vpack.c.bf16 %v64_v37, %v61_v36  ;;  %v62_v43 = vld [vmem:[%s4050_s1 + $0xd0] sm:$0xff]  ;;  %v65_v44 = vld [vmem:[%s4050_s1 + $0xe8] sm:$0xff] }
   0xb   :  { %v67_v45 = vld [vmem:[%s4050_s1 + $0xf8] sm:$0xff]  ;;  %v70_v46 = vld [vmem:[%s4050_s1 + $0x110] sm:$0xff]  ;;  %v2531_v47 = vpack.c.bf16 %v63_v42, %v60_v40  ;;  %v2558_v48 = vpack.c.bf16 %v65_v44, %v62_v43  ;;  %v69_v51 = vld [vmem:[%s4050_s1 + $0x108] sm:$0xff] }
   0xc   :  { %v66_v49 = vld [vmem:[%s4050_s1 + $0xf0] sm:$0xff]  ;;  %v2533_v50 = vpack.c.bf16 %v70_v46, %v67_v45  ;;  %v68_v52 = vld [vmem:[%s4050_s1 + $0x100] sm:$0xff]  ;;  %v71_v53 = vld [vmem:[%s4050_s1 + $0x118] sm:$0xff] }
   0xd   :  { %2524 = vmatpush1.bf16.msra.mxu0 %v2523_v29  ;;  %2553 = vmatpush3.bf16.msra.mxu1 %v2552_v30  ;;  %v73_v54 = vld [vmem:[%s4050_s1 + $0x128] sm:$0xff]  ;;  %v76_v55 = vld [vmem:[%s4050_s1 + $0x140] sm:$0xff]  ;;  %v2535_v56 = vpack.c.bf16 %v69_v51, %v66_v49  ;;  %v2561_v57 = vpack.c.bf16 %v71_v53, %v68_v52  ;;  %v75_v60 = vld [vmem:[%s4050_s1 + $0x138] sm:$0xff] }
   0xe   :  { %2526 = vmatprep.subr.bf16.mxu0 %v2525_v32  ;;  %2554 = vmatprep.subr.bf16.mxu1 %v3174_v5  ;;  %v72_v58 = vld [vmem:[%s4050_s1 + $0x120] sm:$0xff]  ;;  %v2537_v59 = vpack.c.bf16 %v76_v55, %v73_v54  ;;  %v74_v61 = vld [vmem:[%s4050_s1 + $0x130] sm:$0xff]  ;;  %v77_v62 = vld [vmem:[%s4050_s1 + $0x148] sm:$0xff] }
   0xf   :  { %v79_v63 = vld [vmem:[%s4050_s1 + $0x158] sm:$0xff]  ;;  %v82_v0 = vld [vmem:[%s4050_s1 + $0x170] sm:$0xff]  ;;  %v2539_v1 = vpack.c.bf16 %v75_v60, %v72_v58  ;;  %v2564_v2 = vpack.c.bf16 %v77_v62, %v74_v61  ;;  %v81_v6 = vld [vmem:[%s4050_s1 + $0x168] sm:$0xff] }
  0x10   :  { %v78_v3 = vld [vmem:[%s4050_s1 + $0x150] sm:$0xff]  ;;  %v2541_v4 = vpack.c.bf16 %v82_v0, %v79_v63  ;;  %v80_v7 = vld [vmem:[%s4050_s1 + $0x160] sm:$0xff]  ;;  %v83_v9 = vld [vmem:[%s4050_s1 + $0x178] sm:$0xff] }
  0x11   :  { %2528 = vmatpush1.bf16.msra.mxu0 %v2527_v38  ;;  %2556 = vmatpush3.bf16.msra.mxu1 %v2555_v39  ;;  %v256_v10 = vld [vmem:[%s4052_s3 + $0x8] sm:$0xff]  ;;  %v258_v11 = vld [vmem:[%s4052_s3 + $0x18] sm:$0xff] }
  0x12   :  { %2530 = vmatprep.subr.bf16.mxu0 %v2529_v41  ;;  %2557 = vmatprep.subr.bf16.mxu1 %v3174_v5 }
  0x15   :  { %2532 = vmatpush1.bf16.msra.mxu0 %v2531_v47  ;;  %2559 = vmatpush3.bf16.msra.mxu1 %v2558_v48 }
  0x16   :  { %2534 = vmatprep.subr.bf16.mxu0 %v2533_v50  ;;  %2560 = vmatprep.subr.bf16.mxu1 %v3174_v5 }
  0x19   :  { %2536 = vmatpush1.bf16.msra.mxu0 %v2535_v56  ;;  %2562 = vmatpush3.bf16.msra.mxu1 %v2561_v57 }
  0x1a   :  { %2538 = vmatprep.subr.bf16.mxu0 %v2537_v59  ;;  %2563 = vmatprep.subr.bf16.mxu1 %v3174_v5 }
  0x1b   :  { %15 = vsyncpa [#allocation7], 0  ;;  %v2543_v12 = vpack.c.bf16 %v81_v6, %v78_v3  ;;  %v2567_v13 = vpack.c.bf16 %v83_v9, %v80_v7  ;;  %v3386_v14 = vpack.c.bf16 %v258_v11, %v256_v10  ;;  %v255_v15 = vld [vmem:[%s4052_s3] sm:$0xff]  ;;  %v257_v16 = vld [vmem:[%s4052_s3 + $0x10] sm:$0xff]  ;;  %vm1815_vm2 = vcmask 1040384  }
  0x1c   :  { %v260_v17 = vld [vmem:[%s4052_s3 + $0x28] sm:$0xff]  ;;  %v262_v18 = vld [vmem:[%s4052_s3 + $0x38] sm:$0xff]  ;;  %v35_v19 = vld [vmem:[%s4049_s0] sm:$0xff]  ;;  %v3403_v20 = vpack.c.bf16 %v257_v16, %v255_v15  ;;  %vm1817_vm3 = vcmask 1041408   ;;  %vm1819_vm4 = vcmask 1042432   ;;  %vm1821_vm5 = vcmask 1043456  }
  0x1d   :  { %2540 = vmatpush1.bf16.msra.mxu0 %v2539_v1  ;;  %2565 = vmatpush3.bf16.msra.mxu1 %v2564_v2  ;;  %v3406_v21 = vpack.c.bf16 %v262_v18, %v260_v17  ;;  %v259_v22 = vld [vmem:[%s4052_s3 + $0x20] sm:$0xff]  ;;  %v261_v23 = vld [vmem:[%s4052_s3 + $0x30] sm:$0xff]  ;;  %v264_v24 = vld [vmem:[%s4052_s3 + $0x48] sm:$0xff]  ;;  %vm1823_vm6 = vcmask 1044480   ;;  %vm1825_vm7 = vcmask 1045504   ;;  %vm1827_vm8 = vcmask 1046528  }
  0x1e   :  { %2542 = vmatprep.subr.bf16.mxu0 %v2541_v4  ;;  %2566 = vmatprep.subr.bf16.mxu1 %v3174_v5  ;;  %v266_v25 = vld [vmem:[%s4052_s3 + $0x58] sm:$0xff]  ;;  %v3422_v26 = vpack.c.bf16 %v261_v23, %v259_v22  ;;  %v263_v28 = vld [vmem:[%s4052_s3 + $0x40] sm:$0xff]  ;;  %v265_v29 = vld [vmem:[%s4052_s3 + $0x50] sm:$0xff] }
  0x1f   :  { %v3426_v27 = vpack.c.bf16 %v266_v25, %v264_v24  ;;  %v268_v30 = vld [vmem:[%s4052_s3 + $0x68] sm:$0xff]  ;;  %v270_v31 = vld [vmem:[%s4052_s3 + $0x78] sm:$0xff]  ;;  %v3443_v32 = vpack.c.bf16 %v265_v29, %v263_v28  ;;  %v267_v34 = vld [vmem:[%s4052_s3 + $0x60] sm:$0xff]  ;;  %v86_v29 = vlaneseq }
  0x20   :  { %v3446_v33 = vpack.c.bf16 %v270_v31, %v268_v30  ;;  %v269_v35 = vld [vmem:[%s4052_s3 + $0x70] sm:$0xff]  ;;  %v272_v36 = vld [vmem:[%s4052_s3 + $0x88] sm:$0xff]  ;;  %v274_v37 = vld [vmem:[%s4052_s3 + $0x98] sm:$0xff] }
  0x21   :  { %2544 = vmatpush1.bf16.msra.mxu0 %v2543_v12  ;;  %2568 = vmatpush3.bf16.msra.mxu1 %v2567_v13  ;;  %v3461_v38 = vpack.c.bf16 %v269_v35, %v267_v34  ;;  %v3464_v39 = vpack.c.bf16 %v274_v37, %v272_v36  ;;  %v271_v40 = vld [vmem:[%s4052_s3 + $0x80] sm:$0xff]  ;;  %v273_v41 = vld [vmem:[%s4052_s3 + $0x90] sm:$0xff]  ;;  %v276_v42 = vld [vmem:[%s4052_s3 + $0xa8] sm:$0xff]  ;;  %v87_v30 = vshrl.u32 %v86_v29, 7 }
  0x22   :  { %2570 = vmatprep.subr.bf16.mxu0 %v3386_v14  ;;  %2601 = vmatprep.subr.bf16.mxu1 %v3174_v5  ;;  %v278_v43 = vld [vmem:[%s4052_s3 + $0xb8] sm:$0xff]  ;;  %v3479_v44 = vpack.c.bf16 %v273_v41, %v271_v40  ;;  %v275_v46 = vld [vmem:[%s4052_s3 + $0xa0] sm:$0xff]  ;;  %v277_v47 = vld [vmem:[%s4052_s3 + $0xb0] sm:$0xff] }
  0x23   :  { %v3482_v45 = vpack.c.bf16 %v278_v43, %v276_v42  ;;  %v280_v48 = vld [vmem:[%s4052_s3 + $0xc8] sm:$0xff]  ;;  %v282_v49 = vld [vmem:[%s4052_s3 + $0xd8] sm:$0xff]  ;;  %v3497_v50 = vpack.c.bf16 %v277_v47, %v275_v46  ;;  %v279_v52 = vld [vmem:[%s4052_s3 + $0xc0] sm:$0xff]  ;;  %v3632_v31 = vsub.s32 0, %v87_v30  ;;  %v3634_v34 = vsub.s32 2, %v87_v30 }
  0x24   :  { %166 = vmatmul.mubr.f32.vlgmr.msra.gmra.mrb[0].mxu0 %v35_v19  ;;  %2196 = vmatmul.mubr.f32.vlgmr.msra.gmra.mrb[0].mxu1 %v35_v19  ;;  %v3500_v51 = vpack.c.bf16 %v282_v49, %v280_v48  ;;  %v281_v53 = vld [vmem:[%s4052_s3 + $0xd0] sm:$0xff]  ;;  %v284_v54 = vld [vmem:[%s4052_s3 + $0xe8] sm:$0xff]  ;;  %v286_v55 = vld [vmem:[%s4052_s3 + $0xf8] sm:$0xff]  ;;  %v3639_v36 = vsub.s32 1, %v87_v30 }
  0x25   :  { %2572 = vmatpush1.bf16.msra.mxu0 %v3403_v20  ;;  %362 = vmatprep.mubr.f32.mxu0 %v3175_v8  ;;  %v3515_v56 = vpack.c.bf16 %v281_v53, %v279_v52  ;;  %v3518_v57 = vpack.c.bf16 %v286_v55, %v284_v54  ;;  %v283_v58 = vld [vmem:[%s4052_s3 + $0xe0] sm:$0xff]  ;;  %v285_v59 = vld [vmem:[%s4052_s3 + $0xf0] sm:$0xff]  ;;  %v383_v63 = vld [vmem:[%s4053_s4 + $0x8] sm:$0xff] }
  0x26   :  { %2574 = vmatprep.subr.bf16.mxu0 %v3406_v21  ;;  %2230 = vmatprep.mubr.msk.f32.mxu1 %vm3176_vm0, %v3175_v8  ;;  %v3527_v60 = vpack.c.bf16 %v285_v59, %v283_v58  ;;  %v3531_v61 = vld [vmem:[#allocation2] sm:$0x1]  ;;  %v384_v1 = vld [vmem:[%s4053_s4 + $0x10] sm:$0xff]  ;;  %v385_v2 = vld [vmem:[%s4053_s4 + $0x18] sm:$0xff] }
  0x27   :  { %v382_v62 = vld [vmem:[%s4053_s4] sm:$0xff]  ;;  %v3568_v3 = vpack.c.bf16 %v385_v2, %v384_v1  ;;  %v387_v6 = vld [vmem:[%s4053_s4 + $0x28] sm:$0xff]  ;;  %v388_v9 = vld [vmem:[%s4053_s4 + $0x30] sm:$0xff] }
  0x28   :  { %v3558_v0 = vpack.c.bf16 %v383_v63, %v382_v62  ;;  %v386_v4 = vld [vmem:[%s4053_s4 + $0x20] sm:$0xff]  ;;  %v389_v10 = vld [vmem:[%s4053_s4 + $0x38] sm:$0xff]  ;;  %v391_v13 = vld [vmem:[%s4053_s4 + $0x48] sm:$0xff] }
  0x29   :  { %2576 = vmatpush1.bf16.msra.mxu0 %v3422_v26  ;;  %v3578_v7 = vpack.c.bf16 %v387_v6, %v386_v4  ;;  %v3588_v11 = vpack.c.bf16 %v389_v10, %v388_v9  ;;  %v390_v12 = vld [vmem:[%s4053_s4 + $0x40] sm:$0xff]  ;;  %v392_v16 = vld [vmem:[%s4053_s4 + $0x50] sm:$0xff]  ;;  %v393_v17 = vld [vmem:[%s4053_s4 + $0x58] sm:$0xff] }
  0x2a   :  { %2578 = vmatprep.subr.bf16.mxu0 %v3426_v27  ;;  %2603 = vmatpush3.bf16.msra.mxu1 %v3558_v0  ;;  %v3598_v15 = vpack.c.bf16 %v391_v13, %v390_v12  ;;  %v3608_v18 = vpack.c.bf16 %v393_v17, %v392_v16  ;;  %v394_v19 = vld [vmem:[%s4053_s4 + $0x60] sm:$0xff]  ;;  %v395_v22 = vld [vmem:[%s4053_s4 + $0x68] sm:$0xff]  ;;  %v396_v24 = vld [vmem:[%s4053_s4 + $0x70] sm:$0xff] }
  0x2b   :  { %2604 = vmatprep.subr.bf16.mxu1 %v3174_v5  ;;  %v3617_v23 = vpack.c.bf16 %v395_v22, %v394_v19  ;;  %v397_v25 = vld [vmem:[%s4053_s4 + $0x78] sm:$0xff]  ;;  %v84_v35 = vld [vmem:[%s4051_s2] sm:$0x7] }
  0x2c   :  { %v3627_v28 = vpack.c.bf16 %v397_v25, %v396_v24  ;;  %v89_v37 = vrot.slane %v84_v35, %v3632_v31  ;;  %v97_v40 = vrot.slane %v84_v35, %v3634_v34  ;;  %v93_v41 = vrot.slane %v84_v35, %v3639_v36 }
  0x2d   :  { %2580 = vmatpush1.bf16.msra.mxu0 %v3443_v32  ;;  %v246_v24 = vand.u32 127, %v86_v29 }
  0x2e   :  { %2582 = vmatprep.subr.bf16.mxu0 %v3446_v33  ;;  %2606 = vmatpush3.bf16.msra.mxu1 %v3568_v3 }
  0x2f   :  { %2607 = vmatprep.subr.bf16.mxu1 %v3174_v5  ;;  %vm247_vm1 = vcmp.lt.s32.totalorder %v246_v24, 32 }
  0x31   :  { %2584 = vmatpush1.bf16.msra.mxu0 %v3461_v38 }
  0x32   :  { %2586 = vmatprep.subr.bf16.mxu0 %v3464_v39  ;;  %2609 = vmatpush3.bf16.msra.mxu1 %v3578_v7 }
  0x33   :  { %2610 = vmatprep.subr.bf16.mxu1 %v3174_v5 }
  0x35   :  { %2588 = vmatpush1.bf16.msra.mxu0 %v3479_v44 }
  0x36   :  { %2590 = vmatprep.subr.bf16.mxu0 %v3482_v45  ;;  %2612 = vmatpush3.bf16.msra.mxu1 %v3588_v11 }
  0x37   :  { %2613 = vmatprep.subr.bf16.mxu1 %v3174_v5 }
  0x39   :  { %2592 = vmatpush1.bf16.msra.mxu0 %v3497_v50 }
  0x3a   :  { %2594 = vmatprep.subr.bf16.mxu0 %v3500_v51  ;;  %2615 = vmatpush3.bf16.msra.mxu1 %v3598_v15 }
  0x3b   :  { %2616 = vmatprep.subr.bf16.mxu1 %v3174_v5 }
  0x3d   :  { %2596 = vmatpush1.bf16.msra.mxu0 %v3515_v56 }
  0x3e   :  { %2598 = vmatprep.subr.bf16.mxu0 %v3518_v57  ;;  %2618 = vmatpush3.bf16.msra.mxu1 %v3608_v18 }
  0x3f   :  { %2619 = vmatprep.subr.bf16.mxu1 %v3174_v5 }
  0x41   :  { %2600 = vmatpush1.bf16.msra.mxu0 %v3527_v60 }
  0x42   :  { %2626 = vmatprep.subr.bf16.mxu0 %v3386_v14  ;;  %2621 = vmatpush3.bf16.msra.mxu1 %v3617_v23 }
  0x43   :  { %2622 = vmatprep.subr.bf16.mxu1 %v3174_v5 }
  0x44   :  { %363 = vmatmul.mubr.f32.vlgmr.msra.gmra.mrb[2].mxu0 %v3531_v61 }
  0x45   :  { %2628 = vmatpush1.bf16.msra.mxu0 %v3403_v20  ;;  %563 = vmatprep.mubr.f32.mxu0 %v3175_v8 }
  0x46   :  { %2630 = vmatprep.subr.bf16.mxu0 %v3406_v21  ;;  %2624 = vmatpush3.bf16.msra.mxu1 %v3627_v28 }
  0x47   :  { %2657 = vmatprep.subr.bf16.mxu1 %v3174_v5 }
  0x49   :  { %2632 = vmatpush1.bf16.msra.mxu0 %v3422_v26 }
  0x4a   :  { %2634 = vmatprep.subr.bf16.mxu0 %v3426_v27 }
  0x4d   :  { %2636 = vmatpush1.bf16.msra.mxu0 %v3443_v32 }
  0x4e   :  { %2638 = vmatprep.subr.bf16.mxu0 %v3446_v33 }
  0x51   :  { %2640 = vmatpush1.bf16.msra.mxu0 %v3461_v38 }
  0x52   :  { %2642 = vmatprep.subr.bf16.mxu0 %v3464_v39 }
  0x55   :  { %2644 = vmatpush1.bf16.msra.mxu0 %v3479_v44 }
  0x56   :  { %2646 = vmatprep.subr.bf16.mxu0 %v3482_v45 }
  0x59   :  { %2648 = vmatpush1.bf16.msra.mxu0 %v3497_v50 }
  0x5a   :  { %2650 = vmatprep.subr.bf16.mxu0 %v3500_v51 }
  0x5d   :  { %2652 = vmatpush1.bf16.msra.mxu0 %v3515_v56 }
  0x5e   :  { %2654 = vmatprep.subr.bf16.mxu0 %v3518_v57 }
  0x61   :  { %2656 = vmatpush1.bf16.msra.mxu0 %v3527_v60 }
  0x62   :  { %2682 = vmatprep.subr.bf16.mxu0 %v3386_v14 }
  0xf7   :  { %v167_v42 = vpop.f32.mrb[0].mxu0  ;;  %v238_v43 = vpop.f32.mrb[0].mxu1 }
  0xf8   :  { %v168_v46 = vadd.f32 %v167_v42, %v89_v37  ;;  %v169_v47 = vpop.f32.mrb[1].mxu0  ;;  %v239_v48 = vadd.f32 %v238_v43, %v97_v40  ;;  %v2197_v49 = vpop.f32.mrb[1].mxu1  ;;  %v3668_v40 = vsel %vm247_vm1, 1.0, %v3175_v8 }
  0xf9   :  { %v170_v52 = vadd.f32 %v169_v47, %v93_v41 }
  0xfa   :  { %242 = vst [vmem:[#allocation3] sm:$0xff] %v168_v46  ;;  %244 = vst [vmem:[#allocation3 + $0x10] sm:$0xff] %v239_v48 }
  0xfb   :  { %243 = vst [vmem:[#allocation3 + $0x8] sm:$0xff] %v170_v52 }
 0x102   :  { %v254_v53 = vld [vmem:[#allocation3] ss:$8 sm:$0x7] }
 0x103   :  { %v291_v54 = vrot.slane %v254_v53, %v3632_v31  ;;  %v295_v58 = vrot.slane %v254_v53, %v3639_v36  ;;  %v401_v13 = vrot.slane %v254_v53, %v3634_v34 }
 0x117   :  { %v364_v55 = vpop.f32.mrb[2].mxu0 }
 0x118   :  { %v365_v59 = vadd.f32 %v364_v55, %v291_v54  ;;  %v366_v62 = vpop.f32.mrb[3].mxu0 }
 0x119   :  { %v367_v63 = vadd.f32 %v366_v62, %v295_v58 }
 0x11a   :  { %v1976_v10 = vmul.f32 -1.442695, %v365_v59 }
 0x11b   :  { %v1977_v1 = vmul.f32 -1.442695, %v367_v63 }
 0x11d   :  { %3046 = vpow2.f32 %v1977_v1 }
 0x127   :  { %v3047_v2 = vpop.eup %3046 }
 0x128   :  { %v376_v4 = vadd.f32 1.0, %v3047_v2 }
 0x12a   :  { %3048 = vrcp.f32 %v376_v4 }
 0x12b   :  { %3050 = vpow2.f32 %v1976_v10 }
 0x134   :  { %v3049_v6 = vpop.eup %3048 }
 0x135   :  { %v381_v9 = vmul.f32 %v3049_v6, %v3531_v61  ;;  %v3051_v12 = vpop.eup %3050 }
 0x136   :  { %v375_v17 = vadd.f32 1.0, %v3051_v12 }
 0x137   :  { %2231 = vmatmul.mubr.f32.vlgmr.msra.gmra.mrb[2].mxu1 %v381_v9 }
 0x138   :  { %2659 = vmatpush3.bf16.msra.mxu1 %v3558_v0  ;;  %2265 = vmatprep.mubr.msk.f32.mxu1 %vm3176_vm0, %v3175_v8 }
 0x139   :  { %2660 = vmatprep.subr.bf16.mxu1 %v3174_v5 }
 0x13c   :  { %2662 = vmatpush3.bf16.msra.mxu1 %v3568_v3 }
 0x13d   :  { %2663 = vmatprep.subr.bf16.mxu1 %v3174_v5 }
 0x140   :  { %2665 = vmatpush3.bf16.msra.mxu1 %v3578_v7 }
 0x141   :  { %2666 = vmatprep.subr.bf16.mxu1 %v3174_v5 }
 0x144   :  { %2668 = vmatpush3.bf16.msra.mxu1 %v3588_v11 }
 0x145   :  { %2669 = vmatprep.subr.bf16.mxu1 %v3174_v5 }
 0x148   :  { %2671 = vmatpush3.bf16.msra.mxu1 %v3598_v15 }
 0x149   :  { %2672 = vmatprep.subr.bf16.mxu1 %v3174_v5 }
 0x14c   :  { %2674 = vmatpush3.bf16.msra.mxu1 %v3608_v18 }
 0x14d   :  { %2675 = vmatprep.subr.bf16.mxu1 %v3174_v5 }
 0x150   :  { %2677 = vmatpush3.bf16.msra.mxu1 %v3617_v23 }
 0x151   :  { %2678 = vmatprep.subr.bf16.mxu1 %v3174_v5 }
 0x154   :  { %2680 = vmatpush3.bf16.msra.mxu1 %v3627_v28 }
 0x155   :  { %2713 = vmatprep.subr.bf16.mxu1 %v3174_v5 }
 0x20a   :  { %v469_v16 = vpop.f32.mrb[2].mxu1 }
 0x20b   :  { %v470_v19 = vadd.f32 %v469_v16, %v401_v13  ;;  %v2232_v22 = vpop.f32.mrb[3].mxu1 }
 0x20d   :  { %3052 = vtanh.f32 %v470_v19  ;;  %v672_v19 = vld [vmem:[#allocation3 + $0x2] ss:$8 sm:$0x7] }
 0x20e   :  { %3054 = vrcp.f32 %v375_v17  ;;  %v677_v22 = vrot.slane %v672_v19, %v3632_v31 }
 0x217   :  { %v3053_v25 = vpop.eup %3052 }
 0x218   :  { %v474_v30 = vsub.f32 %v3053_v25, %v3531_v61  ;;  %v3055_v35 = vpop.eup %3054  ;;  %v681_v25 = vrot.slane %v672_v19, %v3639_v36 }
 0x21a   :  { %v475_v37 = vmul.f32 %v3055_v35, %v474_v30 }
 0x21c   :  { %v476_v41 = vadd.f32 %v475_v37, %v3531_v61  ;;  %v487_v61 = vld [vmem:[#allocation3 + $0x1] ss:$8 sm:$0x7] }
 0x21d   :  { %v492_v29 = vrot.slane %v487_v61, %v3632_v31  ;;  %v496_v46 = vrot.slane %v487_v61, %v3639_v36  ;;  %v586_v63 = vrot.slane %v487_v61, %v3634_v34 }
 0x21e   :  { %v3672_v42 = vmul.f32 %v3668_v40, %v476_v41 }
 0x220   :  { %564 = vmatmul.mubr.f32.vlgmr.msra.gmra.mrb[4].mxu0 %v3672_v42 }
 0x221   :  { %2684 = vmatpush1.bf16.msra.mxu0 %v3403_v20  ;;  %748 = vmatprep.mubr.f32.mxu0 %v3175_v8 }
 0x222   :  { %2686 = vmatprep.subr.bf16.mxu0 %v3406_v21 }
 0x225   :  { %2688 = vmatpush1.bf16.msra.mxu0 %v3422_v26 }
 0x226   :  { %2690 = vmatprep.subr.bf16.mxu0 %v3426_v27 }
 0x229   :  { %2692 = vmatpush1.bf16.msra.mxu0 %v3443_v32 }
 0x22a   :  { %2694 = vmatprep.subr.bf16.mxu0 %v3446_v33 }
 0x22d   :  { %2696 = vmatpush1.bf16.msra.mxu0 %v3461_v38 }
 0x22e   :  { %2698 = vmatprep.subr.bf16.mxu0 %v3464_v39 }
 0x231   :  { %2700 = vmatpush1.bf16.msra.mxu0 %v3479_v44 }
 0x232   :  { %2702 = vmatprep.subr.bf16.mxu0 %v3482_v45 }
 0x235   :  { %2704 = vmatpush1.bf16.msra.mxu0 %v3497_v50 }
 0x236   :  { %2706 = vmatprep.subr.bf16.mxu0 %v3500_v51 }
 0x239   :  { %2708 = vmatpush1.bf16.msra.mxu0 %v3515_v56 }
 0x23a   :  { %2710 = vmatprep.subr.bf16.mxu0 %v3518_v57 }
 0x23d   :  { %2712 = vmatpush1.bf16.msra.mxu0 %v3527_v60 }
 0x23e   :  { %2738 = vmatprep.subr.bf16.mxu0 %v3386_v14 }
 0x2f3   :  { %v565_v43 = vpop.f32.mrb[4].mxu0 }
 0x2f4   :  { %v566_v47 = vadd.f32 %v565_v43, %v492_v29  ;;  %v567_v48 = vpop.f32.mrb[5].mxu0 }
 0x2f5   :  { %v568_v49 = vadd.f32 %v567_v48, %v496_v46 }
 0x2f6   :  { %v1978_v59 = vmul.f32 -1.442695, %v566_v47 }
 0x2f7   :  { %v1979_v52 = vmul.f32 -1.442695, %v568_v49  ;;  %v771_v49 = vrot.slane %v672_v19, %v3634_v34 }
 0x2f9   :  { %3056 = vpow2.f32 %v1979_v52 }
 0x303   :  { %v3057_v53 = vpop.eup %3056 }
 0x304   :  { %v577_v54 = vadd.f32 1.0, %v3057_v53 }
 0x306   :  { %3058 = vrcp.f32 %v577_v54 }
 0x307   :  { %3060 = vpow2.f32 %v1978_v59 }
 0x310   :  { %v3059_v55 = vpop.eup %3058 }
 0x311   :  { %v582_v58 = vmul.f32 %v3059_v55, %v3672_v42  ;;  %v3061_v62 = vpop.eup %3060 }
 0x312   :  { %v576_v2 = vadd.f32 1.0, %v3061_v62 }
 0x313   :  { %2266 = vmatmul.mubr.f32.vlgmr.msra.gmra.mrb[4].mxu1 %v582_v58 }
 0x314   :  { %2715 = vmatpush3.bf16.msra.mxu1 %v3558_v0  ;;  %2300 = vmatprep.mubr.msk.f32.mxu1 %vm3176_vm0, %v3175_v8 }
 0x315   :  { %2716 = vmatprep.subr.bf16.mxu1 %v3174_v5 }
 0x318   :  { %2718 = vmatpush3.bf16.msra.mxu1 %v3568_v3 }
 0x319   :  { %2719 = vmatprep.subr.bf16.mxu1 %v3174_v5 }
 0x31c   :  { %2721 = vmatpush3.bf16.msra.mxu1 %v3578_v7 }
 0x31d   :  { %2722 = vmatprep.subr.bf16.mxu1 %v3174_v5 }
 0x320   :  { %2724 = vmatpush3.bf16.msra.mxu1 %v3588_v11 }
 0x321   :  { %2725 = vmatprep.subr.bf16.mxu1 %v3174_v5 }
 0x324   :  { %2727 = vmatpush3.bf16.msra.mxu1 %v3598_v15 }
 0x325   :  { %2728 = vmatprep.subr.bf16.mxu1 %v3174_v5 }
 0x328   :  { %2730 = vmatpush3.bf16.msra.mxu1 %v3608_v18 }
 0x329   :  { %2731 = vmatprep.subr.bf16.mxu1 %v3174_v5 }
 0x32c   :  { %2733 = vmatpush3.bf16.msra.mxu1 %v3617_v23 }
 0x32d   :  { %2734 = vmatprep.subr.bf16.mxu1 %v3174_v5 }
 0x330   :  { %2736 = vmatpush3.bf16.msra.mxu1 %v3627_v28 }
 0x331   :  { %2769 = vmatprep.subr.bf16.mxu1 %v3174_v5 }
 0x3e6   :  { %v654_v1 = vpop.f32.mrb[4].mxu1 }
 0x3e7   :  { %v655_v4 = vadd.f32 %v654_v1, %v586_v63  ;;  %v2267_v6 = vpop.f32.mrb[5].mxu1 }
 0x3e9   :  { %3062 = vtanh.f32 %v655_v4  ;;  %v857_v4 = vld [vmem:[#allocation3 + $0x3] ss:$8 sm:$0x7] }
 0x3ea   :  { %3064 = vrcp.f32 %v576_v2  ;;  %v862_v6 = vrot.slane %v857_v4, %v3632_v31 }
 0x3f3   :  { %v3063_v9 = vpop.eup %3062 }
 0x3f4   :  { %v659_v10 = vsub.f32 %v3063_v9, %v3672_v42  ;;  %v3065_v12 = vpop.eup %3064 }
 0x3f6   :  { %v660_v13 = vmul.f32 %v3065_v12, %v659_v10  ;;  %v866_v10 = vrot.slane %v857_v4, %v3639_v36 }
 0x3f8   :  { %v661_v16 = vadd.f32 %v660_v13, %v3672_v42 }
 0x3fa   :  { %v3717_v17 = vmul.f32 %v3668_v40, %v661_v16 }
 0x3fc   :  { %749 = vmatmul.mubr.f32.vlgmr.msra.gmra.mrb[6].mxu0 %v3717_v17 }
 0x3fd   :  { %2740 = vmatpush1.bf16.msra.mxu0 %v3403_v20  ;;  %933 = vmatprep.mubr.f32.mxu0 %v3175_v8 }
 0x3fe   :  { %2742 = vmatprep.subr.bf16.mxu0 %v3406_v21 }
 0x401   :  { %2744 = vmatpush1.bf16.msra.mxu0 %v3422_v26 }
 0x402   :  { %2746 = vmatprep.subr.bf16.mxu0 %v3426_v27 }
 0x405   :  { %2748 = vmatpush1.bf16.msra.mxu0 %v3443_v32 }
 0x406   :  { %2750 = vmatprep.subr.bf16.mxu0 %v3446_v33 }
 0x409   :  { %2752 = vmatpush1.bf16.msra.mxu0 %v3461_v38 }
 0x40a   :  { %2754 = vmatprep.subr.bf16.mxu0 %v3464_v39 }
 0x40d   :  { %2756 = vmatpush1.bf16.msra.mxu0 %v3479_v44 }
 0x40e   :  { %2758 = vmatprep.subr.bf16.mxu0 %v3482_v45 }
 0x411   :  { %2760 = vmatpush1.bf16.msra.mxu0 %v3497_v50 }
 0x412   :  { %2762 = vmatprep.subr.bf16.mxu0 %v3500_v51 }
 0x415   :  { %2764 = vmatpush1.bf16.msra.mxu0 %v3515_v56 }
 0x416   :  { %2766 = vmatprep.subr.bf16.mxu0 %v3518_v57 }
 0x419   :  { %2768 = vmatpush1.bf16.msra.mxu0 %v3527_v60 }
 0x41a   :  { %2794 = vmatprep.subr.bf16.mxu0 %v3386_v14 }
 0x4cf   :  { %v750_v24 = vpop.f32.mrb[6].mxu0 }
 0x4d0   :  { %v751_v30 = vadd.f32 %v750_v24, %v677_v22  ;;  %v752_v35 = vpop.f32.mrb[7].mxu0 }
 0x4d1   :  { %v753_v37 = vadd.f32 %v752_v35, %v681_v25 }
 0x4d2   :  { %v1980_v47 = vmul.f32 -1.442695, %v751_v30 }
 0x4d3   :  { %v1981_v41 = vmul.f32 -1.442695, %v753_v37 }
 0x4d5   :  { %3066 = vpow2.f32 %v1981_v41  ;;  %v956_v41 = vrot.slane %v857_v4, %v3634_v34 }
 0x4df   :  { %v3067_v61 = vpop.eup %3066 }
 0x4e0   :  { %v762_v29 = vadd.f32 1.0, %v3067_v61 }
 0x4e2   :  { %3068 = vrcp.f32 %v762_v29 }
 0x4e3   :  { %3070 = vpow2.f32 %v1980_v47 }
 0x4ec   :  { %v3069_v43 = vpop.eup %3068 }
 0x4ed   :  { %v767_v46 = vmul.f32 %v3069_v43, %v3717_v17  ;;  %v3071_v48 = vpop.eup %3070 }
 0x4ee   :  { %v761_v53 = vadd.f32 1.0, %v3071_v48 }
 0x4ef   :  { %2301 = vmatmul.mubr.f32.vlgmr.msra.gmra.mrb[6].mxu1 %v767_v46 }
 0x4f0   :  { %2771 = vmatpush3.bf16.msra.mxu1 %v3558_v0  ;;  %2335 = vmatprep.mubr.msk.f32.mxu1 %vm3176_vm0, %v3175_v8 }
 0x4f1   :  { %2772 = vmatprep.subr.bf16.mxu1 %v3174_v5 }
 0x4f4   :  { %2774 = vmatpush3.bf16.msra.mxu1 %v3568_v3 }
 0x4f5   :  { %2775 = vmatprep.subr.bf16.mxu1 %v3174_v5 }
 0x4f8   :  { %2777 = vmatpush3.bf16.msra.mxu1 %v3578_v7 }
 0x4f9   :  { %2778 = vmatprep.subr.bf16.mxu1 %v3174_v5 }
 0x4fc   :  { %2780 = vmatpush3.bf16.msra.mxu1 %v3588_v11 }
 0x4fd   :  { %2781 = vmatprep.subr.bf16.mxu1 %v3174_v5 }
 0x500   :  { %2783 = vmatpush3.bf16.msra.mxu1 %v3598_v15 }
 0x501   :  { %2784 = vmatprep.subr.bf16.mxu1 %v3174_v5 }
 0x504   :  { %2786 = vmatpush3.bf16.msra.mxu1 %v3608_v18 }
 0x505   :  { %2787 = vmatprep.subr.bf16.mxu1 %v3174_v5 }
 0x508   :  { %2789 = vmatpush3.bf16.msra.mxu1 %v3617_v23 }
 0x509   :  { %2790 = vmatprep.subr.bf16.mxu1 %v3174_v5 }
 0x50c   :  { %2792 = vmatpush3.bf16.msra.mxu1 %v3627_v28 }
 0x50d   :  { %2825 = vmatprep.subr.bf16.mxu1 %v3174_v5 }
 0x5c2   :  { %v839_v52 = vpop.f32.mrb[6].mxu1 }
 0x5c3   :  { %v840_v54 = vadd.f32 %v839_v52, %v771_v49  ;;  %v2302_v55 = vpop.f32.mrb[7].mxu1 }
 0x5c4   :  { %v1042_v55 = vld [vmem:[#allocation3 + $0x4] ss:$8 sm:$0x7] }
 0x5c5   :  { %3072 = vtanh.f32 %v840_v54 }
 0x5c6   :  { %3074 = vrcp.f32 %v761_v53 }
 0x5cf   :  { %v3073_v58 = vpop.eup %3072 }
 0x5d0   :  { %v844_v59 = vsub.f32 %v3073_v58, %v3717_v17  ;;  %v3075_v62 = vpop.eup %3074  ;;  %v1047_v58 = vrot.slane %v1042_v55, %v3632_v31 }
 0x5d2   :  { %v845_v63 = vmul.f32 %v3075_v62, %v844_v59  ;;  %v1051_v62 = vrot.slane %v1042_v55, %v3639_v36 }
 0x5d4   :  { %v846_v1 = vadd.f32 %v845_v63, %v3717_v17 }
 0x5d6   :  { %v3762_v2 = vmul.f32 %v3668_v40, %v846_v1 }
 0x5d8   :  { %934 = vmatmul.mubr.f32.vlgmr.msra.gmra.mrb[8].mxu0 %v3762_v2 }
 0x5d9   :  { %2796 = vmatpush1.bf16.msra.mxu0 %v3403_v20  ;;  %1118 = vmatprep.mubr.f32.mxu0 %v3175_v8 }
 0x5da   :  { %2798 = vmatprep.subr.bf16.mxu0 %v3406_v21 }
 0x5dd   :  { %2800 = vmatpush1.bf16.msra.mxu0 %v3422_v26 }
 0x5de   :  { %2802 = vmatprep.subr.bf16.mxu0 %v3426_v27 }
 0x5e1   :  { %2804 = vmatpush1.bf16.msra.mxu0 %v3443_v32 }
 0x5e2   :  { %2806 = vmatprep.subr.bf16.mxu0 %v3446_v33 }
 0x5e5   :  { %2808 = vmatpush1.bf16.msra.mxu0 %v3461_v38 }
 0x5e6   :  { %2810 = vmatprep.subr.bf16.mxu0 %v3464_v39 }
 0x5e9   :  { %2812 = vmatpush1.bf16.msra.mxu0 %v3479_v44 }
 0x5ea   :  { %2814 = vmatprep.subr.bf16.mxu0 %v3482_v45 }
 0x5ed   :  { %2816 = vmatpush1.bf16.msra.mxu0 %v3497_v50 }
 0x5ee   :  { %2818 = vmatprep.subr.bf16.mxu0 %v3500_v51 }
 0x5f1   :  { %2820 = vmatpush1.bf16.msra.mxu0 %v3515_v56 }
 0x5f2   :  { %2822 = vmatprep.subr.bf16.mxu0 %v3518_v57 }
 0x5f5   :  { %2824 = vmatpush1.bf16.msra.mxu0 %v3527_v60 }
 0x5f6   :  { %2850 = vmatprep.subr.bf16.mxu0 %v3386_v14 }
 0x6ab   :  { %v935_v9 = vpop.f32.mrb[8].mxu0 }
 0x6ac   :  { %v936_v12 = vadd.f32 %v935_v9, %v862_v6  ;;  %v937_v13 = vpop.f32.mrb[9].mxu0 }
 0x6ad   :  { %v938_v16 = vadd.f32 %v937_v13, %v866_v10 }
 0x6ae   :  { %v1982_v35 = vmul.f32 -1.442695, %v936_v12 }
 0x6af   :  { %v1983_v19 = vmul.f32 -1.442695, %v938_v16 }
 0x6b1   :  { %3076 = vpow2.f32 %v1983_v19 }
 0x6bb   :  { %v3077_v22 = vpop.eup %3076 }
 0x6bc   :  { %v947_v24 = vadd.f32 1.0, %v3077_v22  ;;  %v1141_v22 = vrot.slane %v1042_v55, %v3634_v34 }
 0x6be   :  { %3078 = vrcp.f32 %v947_v24 }
 0x6bf   :  { %3080 = vpow2.f32 %v1982_v35 }
 0x6c8   :  { %v3079_v25 = vpop.eup %3078 }
 0x6c9   :  { %v952_v30 = vmul.f32 %v3079_v25, %v3762_v2  ;;  %v3081_v37 = vpop.eup %3080 }
 0x6ca   :  { %v946_v29 = vadd.f32 1.0, %v3081_v37 }
 0x6cb   :  { %2336 = vmatmul.mubr.f32.vlgmr.msra.gmra.mrb[8].mxu1 %v952_v30 }
 0x6cc   :  { %2827 = vmatpush3.bf16.msra.mxu1 %v3558_v0  ;;  %2370 = vmatprep.mubr.msk.f32.mxu1 %vm3176_vm0, %v3175_v8 }
 0x6cd   :  { %2828 = vmatprep.subr.bf16.mxu1 %v3174_v5 }
 0x6d0   :  { %2830 = vmatpush3.bf16.msra.mxu1 %v3568_v3 }
 0x6d1   :  { %2831 = vmatprep.subr.bf16.mxu1 %v3174_v5 }
 0x6d4   :  { %2833 = vmatpush3.bf16.msra.mxu1 %v3578_v7 }
 0x6d5   :  { %2834 = vmatprep.subr.bf16.mxu1 %v3174_v5 }
 0x6d8   :  { %2836 = vmatpush3.bf16.msra.mxu1 %v3588_v11 }
 0x6d9   :  { %2837 = vmatprep.subr.bf16.mxu1 %v3174_v5 }
 0x6dc   :  { %2839 = vmatpush3.bf16.msra.mxu1 %v3598_v15 }
 0x6dd   :  { %2840 = vmatprep.subr.bf16.mxu1 %v3174_v5 }
 0x6e0   :  { %2842 = vmatpush3.bf16.msra.mxu1 %v3608_v18 }
 0x6e1   :  { %2843 = vmatprep.subr.bf16.mxu1 %v3174_v5 }
 0x6e4   :  { %2845 = vmatpush3.bf16.msra.mxu1 %v3617_v23 }
 0x6e5   :  { %2846 = vmatprep.subr.bf16.mxu1 %v3174_v5 }
 0x6e8   :  { %2848 = vmatpush3.bf16.msra.mxu1 %v3627_v28 }
 0x6e9   :  { %2881 = vmatprep.subr.bf16.mxu1 %v3174_v5 }
 0x79e   :  { %v1024_v61 = vpop.f32.mrb[8].mxu1 }
 0x79f   :  { %v1025_v43 = vadd.f32 %v1024_v61, %v956_v41  ;;  %v2337_v46 = vpop.f32.mrb[9].mxu1 }
 0x7a1   :  { %3082 = vtanh.f32 %v1025_v43 }
 0x7a2   :  { %3084 = vrcp.f32 %v946_v29 }
 0x7ab   :  { %v3083_v47 = vpop.eup %3082 }
 0x7ac   :  { %v1029_v48 = vsub.f32 %v3083_v47, %v3762_v2  ;;  %v3085_v49 = vpop.eup %3084  ;;  %v1227_v47 = vld [vmem:[#allocation3 + $0x5] ss:$8 sm:$0x7] }
 0x7ae   :  { %v1030_v52 = vmul.f32 %v3085_v49, %v1029_v48  ;;  %v1232_v48 = vrot.slane %v1227_v47, %v3632_v31 }
 0x7b0   :  { %v1031_v53 = vadd.f32 %v1030_v52, %v3762_v2  ;;  %v1236_v52 = vrot.slane %v1227_v47, %v3639_v36 }
 0x7b2   :  { %v3807_v54 = vmul.f32 %v3668_v40, %v1031_v53 }
 0x7b4   :  { %1119 = vmatmul.mubr.f32.vlgmr.msra.gmra.mrb[10].mxu0 %v3807_v54 }
 0x7b5   :  { %2852 = vmatpush1.bf16.msra.mxu0 %v3403_v20  ;;  %1303 = vmatprep.mubr.f32.mxu0 %v3175_v8 }
 0x7b6   :  { %2854 = vmatprep.subr.bf16.mxu0 %v3406_v21 }
 0x7b9   :  { %2856 = vmatpush1.bf16.msra.mxu0 %v3422_v26 }
 0x7ba   :  { %2858 = vmatprep.subr.bf16.mxu0 %v3426_v27 }
 0x7bd   :  { %2860 = vmatpush1.bf16.msra.mxu0 %v3443_v32 }
 0x7be   :  { %2862 = vmatprep.subr.bf16.mxu0 %v3446_v33 }
 0x7c1   :  { %2864 = vmatpush1.bf16.msra.mxu0 %v3461_v38 }
 0x7c2   :  { %2866 = vmatprep.subr.bf16.mxu0 %v3464_v39 }
 0x7c5   :  { %2868 = vmatpush1.bf16.msra.mxu0 %v3479_v44 }
 0x7c6   :  { %2870 = vmatprep.subr.bf16.mxu0 %v3482_v45 }
 0x7c9   :  { %2872 = vmatpush1.bf16.msra.mxu0 %v3497_v50 }
 0x7ca   :  { %2874 = vmatprep.subr.bf16.mxu0 %v3500_v51 }
 0x7cd   :  { %2876 = vmatpush1.bf16.msra.mxu0 %v3515_v56 }
 0x7ce   :  { %2878 = vmatprep.subr.bf16.mxu0 %v3518_v57 }
 0x7d1   :  { %2880 = vmatpush1.bf16.msra.mxu0 %v3527_v60 }
 0x7d2   :  { %2906 = vmatprep.subr.bf16.mxu0 %v3386_v14 }
 0x887   :  { %v1120_v59 = vpop.f32.mrb[10].mxu0 }
 0x888   :  { %v1121_v63 = vadd.f32 %v1120_v59, %v1047_v58  ;;  %v1122_v1 = vpop.f32.mrb[11].mxu0 }
 0x889   :  { %v1123_v4 = vadd.f32 %v1122_v1, %v1051_v62 }
 0x88a   :  { %v1984_v16 = vmul.f32 -1.442695, %v1121_v63 }
 0x88b   :  { %v1985_v6 = vmul.f32 -1.442695, %v1123_v4 }
 0x88d   :  { %3086 = vpow2.f32 %v1985_v6 }
 0x897   :  { %v3087_v9 = vpop.eup %3086 }
 0x898   :  { %v1132_v10 = vadd.f32 1.0, %v3087_v9  ;;  %v1326_v9 = vrot.slane %v1227_v47, %v3634_v34 }
 0x89a   :  { %3088 = vrcp.f32 %v1132_v10 }
 0x89b   :  { %3090 = vpow2.f32 %v1984_v16 }
 0x8a4   :  { %v3089_v12 = vpop.eup %3088 }
 0x8a5   :  { %v1137_v13 = vmul.f32 %v3089_v12, %v3807_v54  ;;  %v3091_v19 = vpop.eup %3090 }
 0x8a6   :  { %v1131_v25 = vadd.f32 1.0, %v3091_v19 }
 0x8a7   :  { %2371 = vmatmul.mubr.f32.vlgmr.msra.gmra.mrb[10].mxu1 %v1137_v13 }
 0x8a8   :  { %2883 = vmatpush3.bf16.msra.mxu1 %v3558_v0  ;;  %2405 = vmatprep.mubr.msk.f32.mxu1 %vm3176_vm0, %v3175_v8 }
 0x8a9   :  { %2884 = vmatprep.subr.bf16.mxu1 %v3174_v5 }
 0x8ac   :  { %2886 = vmatpush3.bf16.msra.mxu1 %v3568_v3 }
 0x8ad   :  { %2887 = vmatprep.subr.bf16.mxu1 %v3174_v5 }
 0x8b0   :  { %2889 = vmatpush3.bf16.msra.mxu1 %v3578_v7 }
 0x8b1   :  { %2890 = vmatprep.subr.bf16.mxu1 %v3174_v5 }
 0x8b4   :  { %2892 = vmatpush3.bf16.msra.mxu1 %v3588_v11 }
 0x8b5   :  { %2893 = vmatprep.subr.bf16.mxu1 %v3174_v5 }
 0x8b8   :  { %2895 = vmatpush3.bf16.msra.mxu1 %v3598_v15 }
 0x8b9   :  { %2896 = vmatprep.subr.bf16.mxu1 %v3174_v5 }
 0x8bc   :  { %2898 = vmatpush3.bf16.msra.mxu1 %v3608_v18 }
 0x8bd   :  { %2899 = vmatprep.subr.bf16.mxu1 %v3174_v5 }
 0x8c0   :  { %2901 = vmatpush3.bf16.msra.mxu1 %v3617_v23 }
 0x8c1   :  { %2902 = vmatprep.subr.bf16.mxu1 %v3174_v5 }
 0x8c4   :  { %2904 = vmatpush3.bf16.msra.mxu1 %v3627_v28 }
 0x8c5   :  { %2937 = vmatprep.subr.bf16.mxu1 %v3174_v5 }
 0x97a   :  { %v1209_v24 = vpop.f32.mrb[10].mxu1 }
 0x97b   :  { %v1210_v30 = vadd.f32 %v1209_v24, %v1141_v22  ;;  %v2372_v35 = vpop.f32.mrb[11].mxu1 }
 0x97d   :  { %3092 = vtanh.f32 %v1210_v30 }
 0x97e   :  { %3094 = vrcp.f32 %v1131_v25 }
 0x987   :  { %v3093_v37 = vpop.eup %3092 }
 0x988   :  { %v1214_v41 = vsub.f32 %v3093_v37, %v3807_v54  ;;  %v3095_v61 = vpop.eup %3094 }
 0x98a   :  { %v1215_v29 = vmul.f32 %v3095_v61, %v1214_v41  ;;  %v1597_v61 = vld [vmem:[#allocation3 + $0x7] ss:$8 sm:$0x7] }
 0x98b   :  { %v1606_v47 = vrot.slane %v1597_v61, %v3639_v36 }
 0x98c   :  { %v1216_v43 = vadd.f32 %v1215_v29, %v3807_v54  ;;  %v1602_v29 = vrot.slane %v1597_v61, %v3632_v31 }
 0x98e   :  { %v3852_v46 = vmul.f32 %v3668_v40, %v1216_v43 }
 0x990   :  { %1304 = vmatmul.mubr.f32.vlgmr.msra.gmra.mrb[12].mxu0 %v3852_v46 }
 0x991   :  { %2908 = vmatpush1.bf16.msra.mxu0 %v3403_v20  ;;  %1488 = vmatprep.mubr.f32.mxu0 %v3175_v8 }
 0x992   :  { %2910 = vmatprep.subr.bf16.mxu0 %v3406_v21 }
 0x995   :  { %2912 = vmatpush1.bf16.msra.mxu0 %v3422_v26 }
 0x996   :  { %2914 = vmatprep.subr.bf16.mxu0 %v3426_v27 }
 0x999   :  { %2916 = vmatpush1.bf16.msra.mxu0 %v3443_v32 }
 0x99a   :  { %2918 = vmatprep.subr.bf16.mxu0 %v3446_v33 }
 0x99d   :  { %2920 = vmatpush1.bf16.msra.mxu0 %v3461_v38 }
 0x99e   :  { %2922 = vmatprep.subr.bf16.mxu0 %v3464_v39 }
 0x9a1   :  { %2924 = vmatpush1.bf16.msra.mxu0 %v3479_v44 }
 0x9a2   :  { %2926 = vmatprep.subr.bf16.mxu0 %v3482_v45 }
 0x9a5   :  { %2928 = vmatpush1.bf16.msra.mxu0 %v3497_v50 }
 0x9a6   :  { %2930 = vmatprep.subr.bf16.mxu0 %v3500_v51 }
 0x9a9   :  { %2932 = vmatpush1.bf16.msra.mxu0 %v3515_v56 }
 0x9aa   :  { %2934 = vmatprep.subr.bf16.mxu0 %v3518_v57 }
 0x9ad   :  { %2936 = vmatpush1.bf16.msra.mxu0 %v3527_v60 }
 0x9ae   :  { %2962 = vmatprep.subr.bf16.mxu0 %v3386_v14 }
 0xa63   :  { %v1305_v49 = vpop.f32.mrb[12].mxu0 }
 0xa64   :  { %v1306_v53 = vadd.f32 %v1305_v49, %v1232_v48  ;;  %v1307_v55 = vpop.f32.mrb[13].mxu0 }
 0xa65   :  { %v1308_v58 = vadd.f32 %v1307_v55, %v1236_v52 }
 0xa66   :  { %v1986_v14 = vmul.f32 -1.442695, %v1306_v53 }
 0xa67   :  { %v1987_v59 = vmul.f32 -1.442695, %v1308_v58 }
 0xa69   :  { %3096 = vpow2.f32 %v1987_v59 }
 0xa73   :  { %v3097_v62 = vpop.eup %3096 }
 0xa74   :  { %v1317_v63 = vadd.f32 1.0, %v3097_v62 }
 0xa76   :  { %3098 = vrcp.f32 %v1317_v63 }
 0xa77   :  { %3100 = vpow2.f32 %v1986_v14 }
 0xa80   :  { %v3099_v1 = vpop.eup %3098 }
 0xa81   :  { %v1322_v4 = vmul.f32 %v3099_v1, %v3852_v46  ;;  %v3101_v6 = vpop.eup %3100  ;;  %v1834_v1 = vld [vmem:[%s4054_s5 + $0x10] sm:$0xff] }
 0xa82   :  { %v1316_v12 = vadd.f32 1.0, %v3101_v6  ;;  %v1836_v6 = vld [vmem:[%s4054_s5 + $0x20] sm:$0xff] }
 0xa83   :  { %2406 = vmatmul.mubr.f32.vlgmr.msra.gmra.mrb[12].mxu1 %v1322_v4  ;;  %v1835_v4 = vld [vmem:[%s4054_s5 + $0x18] sm:$0xff] }
 0xa84   :  { %2939 = vmatpush3.bf16.msra.mxu1 %v3558_v0  ;;  %2440 = vmatprep.mubr.msk.f32.mxu1 %vm3176_vm0, %v3175_v8  ;;  %v3021_v14 = vpack.c.bf16 %v1835_v4, %v1834_v1 }
 0xa85   :  { %2940 = vmatprep.subr.bf16.mxu1 %v3174_v5 }
 0xa88   :  { %2942 = vmatpush3.bf16.msra.mxu1 %v3568_v3 }
 0xa89   :  { %2943 = vmatprep.subr.bf16.mxu1 %v3174_v5 }
 0xa8c   :  { %2945 = vmatpush3.bf16.msra.mxu1 %v3578_v7 }
 0xa8d   :  { %2946 = vmatprep.subr.bf16.mxu1 %v3174_v5 }
 0xa90   :  { %2948 = vmatpush3.bf16.msra.mxu1 %v3588_v11 }
 0xa91   :  { %2949 = vmatprep.subr.bf16.mxu1 %v3174_v5 }
 0xa94   :  { %2951 = vmatpush3.bf16.msra.mxu1 %v3598_v15 }
 0xa95   :  { %2952 = vmatprep.subr.bf16.mxu1 %v3174_v5 }
 0xa98   :  { %2954 = vmatpush3.bf16.msra.mxu1 %v3608_v18 }
 0xa99   :  { %2955 = vmatprep.subr.bf16.mxu1 %v3174_v5 }
 0xa9c   :  { %2957 = vmatpush3.bf16.msra.mxu1 %v3617_v23 }
 0xa9d   :  { %2958 = vmatprep.subr.bf16.mxu1 %v3174_v5 }
 0xaa0   :  { %2960 = vmatpush3.bf16.msra.mxu1 %v3627_v28 }
 0xaa1   :  { %2993 = vmatprep.subr.bf16.mxu1 %v3174_v5 }
 0xb56   :  { %v1394_v10 = vpop.f32.mrb[12].mxu1 }
 0xb57   :  { %v1395_v13 = vadd.f32 %v1394_v10, %v1326_v9  ;;  %v2407_v16 = vpop.f32.mrb[13].mxu1  ;;  %v1837_v9 = vld [vmem:[%s4054_s5 + $0x28] sm:$0xff] }
 0xb58   :  { %v3024_v10 = vpack.c.bf16 %v1837_v9, %v1836_v6 }
 0xb59   :  { %3102 = vtanh.f32 %v1395_v13  ;;  %v1839_v13 = vld [vmem:[%s4054_s5 + $0x38] sm:$0xff] }
 0xb5a   :  { %3104 = vrcp.f32 %v1316_v12  ;;  %v1838_v12 = vld [vmem:[%s4054_s5 + $0x30] sm:$0xff] }
 0xb5b   :  { %v3027_v16 = vpack.c.bf16 %v1839_v13, %v1838_v12 }
 0xb63   :  { %v3103_v19 = vpop.eup %3102 }
 0xb64   :  { %v1399_v22 = vsub.f32 %v3103_v19, %v3852_v46  ;;  %v3105_v24 = vpop.eup %3104  ;;  %v1840_v19 = vld [vmem:[%s4054_s5 + $0x40] sm:$0xff] }
 0xb66   :  { %v1400_v25 = vmul.f32 %v3105_v24, %v1399_v22  ;;  %v1841_v22 = vld [vmem:[%s4054_s5 + $0x48] sm:$0xff] }
 0xb67   :  { %v3030_v24 = vpack.c.bf16 %v1841_v22, %v1840_v19 }
 0xb68   :  { %v1401_v30 = vadd.f32 %v1400_v25, %v3852_v46  ;;  %v1842_v25 = vld [vmem:[%s4054_s5 + $0x50] sm:$0xff] }
 0xb6a   :  { %v3897_v35 = vmul.f32 %v3668_v40, %v1401_v30  ;;  %v1843_v30 = vld [vmem:[%s4054_s5 + $0x58] sm:$0xff] }
 0xb6c   :  { %1489 = vmatmul.mubr.f32.vlgmr.msra.gmra.mrb[14].mxu0 %v3897_v35 }
 0xb6d   :  { %2964 = vmatpush1.bf16.msra.mxu0 %v3403_v20  ;;  %1673 = vmatprep.mubr.f32.mxu0 %v3175_v8  ;;  %v1412_v20 = vld [vmem:[#allocation3 + $0x6] ss:$8 sm:$0x7] }
 0xb6e   :  { %2966 = vmatprep.subr.bf16.mxu0 %v3406_v21  ;;  %v1417_v21 = vrot.slane %v1412_v20, %v3632_v31 }
 0xb71   :  { %2968 = vmatpush1.bf16.msra.mxu0 %v3422_v26 }
 0xb72   :  { %2970 = vmatprep.subr.bf16.mxu0 %v3426_v27  ;;  %v1421_v27 = vrot.slane %v1412_v20, %v3639_v36  ;;  %v1833_v36 = vld [vmem:[%s4054_s5 + $0x8] sm:$0xff] }
 0xb75   :  { %2972 = vmatpush1.bf16.msra.mxu0 %v3443_v32 }
 0xb76   :  { %2974 = vmatprep.subr.bf16.mxu0 %v3446_v33 }
 0xb79   :  { %2976 = vmatpush1.bf16.msra.mxu0 %v3461_v38 }
 0xb7a   :  { %2978 = vmatprep.subr.bf16.mxu0 %v3464_v39 }
 0xb7d   :  { %2980 = vmatpush1.bf16.msra.mxu0 %v3479_v44 }
 0xb7e   :  { %2982 = vmatprep.subr.bf16.mxu0 %v3482_v45 }
 0xb81   :  { %2984 = vmatpush1.bf16.msra.mxu0 %v3497_v50 }
 0xb82   :  { %2986 = vmatprep.subr.bf16.mxu0 %v3500_v51 }
 0xb85   :  { %2988 = vmatpush1.bf16.msra.mxu0 %v3515_v56 }
 0xb86   :  { %2990 = vmatprep.subr.bf16.mxu0 %v3518_v57 }
 0xb89   :  { %2992 = vmatpush1.bf16.msra.mxu0 %v3527_v60  ;;  %v1511_v60 = vrot.slane %v1412_v20, %v3634_v34  ;;  %v3033_v20 = vpack.c.bf16 %v1843_v30, %v1842_v25 }
 0xb8a   :  { %3017 = vmatprep.subr.bf16.mxu0 %v3174_v5 }
 0xc3f   :  { %v1490_v26 = vpop.f32.mrb[14].mxu0 }
 0xc40   :  { %v1491_v32 = vadd.f32 %v1490_v26, %v1417_v21  ;;  %v1492_v33 = vpop.f32.mrb[15].mxu0  ;;  %v1844_v21 = vld [vmem:[%s4054_s5 + $0x60] sm:$0xff]  ;;  %v1845_v26 = vld [vmem:[%s4054_s5 + $0x68] sm:$0xff] }
 0xc41   :  { %v1493_v38 = vadd.f32 %v1492_v33, %v1421_v27  ;;  %v3036_v27 = vpack.c.bf16 %v1845_v26, %v1844_v21  ;;  %v1847_v33 = vld [vmem:[%s4054_s5 + $0x78] sm:$0xff] }
 0xc42   :  { %v1988_v56 = vmul.f32 -1.442695, %v1491_v32  ;;  %v1846_v32 = vld [vmem:[%s4054_s5 + $0x70] sm:$0xff] }
 0xc43   :  { %v1989_v39 = vmul.f32 -1.442695, %v1493_v38  ;;  %v3039_v38 = vpack.c.bf16 %v1847_v33, %v1846_v32 }
 0xc45   :  { %3106 = vpow2.f32 %v1989_v39 }
 0xc4f   :  { %v3107_v44 = vpop.eup %3106 }
 0xc50   :  { %v1502_v45 = vadd.f32 1.0, %v3107_v44 }
 0xc52   :  { %3108 = vrcp.f32 %v1502_v45  ;;  %v1696_v45 = vrot.slane %v1597_v61, %v3634_v34  ;;  %v1789_v34 = vrot.slane %v3807_v54, %v3632_v31 }
 0xc53   :  { %3110 = vpow2.f32 %v1988_v56 }
 0xc5c   :  { %v3109_v50 = vpop.eup %3108 }
 0xc5d   :  { %v1507_v51 = vmul.f32 %v3109_v50, %v3897_v35  ;;  %v3111_v57 = vpop.eup %3110 }
 0xc5f   :  { %2441 = vmatmul.mubr.f32.vlgmr.msra.gmra.mrb[14].mxu1 %v1507_v51 }
 0xc60   :  { %2995 = vmatpush3.bf16.msra.mxu1 %v3558_v0  ;;  %2475 = vmatprep.mubr.msk.f32.mxu1 %vm3176_vm0, %v3175_v8 }
 0xc61   :  { %2996 = vmatprep.subr.bf16.mxu1 %v3174_v5 }
 0xc64   :  { %2998 = vmatpush3.bf16.msra.mxu1 %v3568_v3  ;;  %v1501_v3 = vadd.f32 1.0, %v3111_v57 }
 0xc65   :  { %2999 = vmatprep.subr.bf16.mxu1 %v3174_v5 }
 0xc68   :  { %3001 = vmatpush3.bf16.msra.mxu1 %v3578_v7 }
 0xc69   :  { %3002 = vmatprep.subr.bf16.mxu1 %v3174_v5 }
 0xc6c   :  { %3004 = vmatpush3.bf16.msra.mxu1 %v3588_v11 }
 0xc6d   :  { %3005 = vmatprep.subr.bf16.mxu1 %v3174_v5 }
 0xc70   :  { %3007 = vmatpush3.bf16.msra.mxu1 %v3598_v15 }
 0xc71   :  { %3008 = vmatprep.subr.bf16.mxu1 %v3174_v5 }
 0xc74   :  { %3010 = vmatpush3.bf16.msra.mxu1 %v3608_v18 }
 0xc75   :  { %3011 = vmatprep.subr.bf16.mxu1 %v3174_v5 }
 0xc78   :  { %3013 = vmatpush3.bf16.msra.mxu1 %v3617_v23 }
 0xc79   :  { %3014 = vmatprep.subr.bf16.mxu1 %v3174_v5 }
 0xc7c   :  { %3016 = vmatpush3.bf16.msra.mxu1 %v3627_v28 }
 0xd32   :  { %v1579_v0 = vpop.f32.mrb[14].mxu1 }
 0xd33   :  { %v1580_v7 = vadd.f32 %v1579_v0, %v1511_v60  ;;  %v2442_v11 = vpop.f32.mrb[15].mxu1  ;;  %v1777_v60 = vrot.slane %v3717_v17, %v3632_v31  ;;  %v1801_v17 = vrot.slane %v3897_v35, %v3632_v31 }
 0xd35   :  { %3112 = vtanh.f32 %v1580_v7  ;;  %v1783_v7 = vrot.slane %v3762_v2, %v3632_v31 }
 0xd36   :  { %3114 = vrcp.f32 %v1501_v3 }
 0xd3f   :  { %v3113_v15 = vpop.eup %3112 }
 0xd40   :  { %v1584_v18 = vsub.f32 %v3113_v15, %v3897_v35  ;;  %v3115_v37 = vpop.eup %3114  ;;  %v1795_v15 = vrot.slane %v3852_v46, %v3632_v31 }
 0xd42   :  { %v1585_v23 = vmul.f32 %v3115_v37, %v1584_v18  ;;  %v1816_v18 = vsel %vm1815_vm2, %v3672_v42, %v1777_v60 }
 0xd44   :  { %v1586_v41 = vadd.f32 %v1585_v23, %v3897_v35  ;;  %v1818_v23 = vsel %vm1817_vm3, %v1816_v18, %v1783_v7 }
 0xd46   :  { %v3941_v28 = vmul.f32 %v3668_v40, %v1586_v41  ;;  %v1820_v41 = vsel %vm1819_vm4, %v1818_v23, %v1789_v34 }
 0xd47   :  { %v1822_v61 = vsel %vm1821_vm5, %v1820_v41, %v1795_v15 }
 0xd48   :  { %1674 = vmatmul.mubr.f32.vlgmr.msra.gmra.mrb[16].mxu0 %v3941_v28  ;;  %v1807_v2 = vrot.slane %v3941_v28, %v3632_v31  ;;  %v1824_v42 = vsel %vm1823_vm6, %v1822_v61, %v1801_v17 }
 0xd49   :  { %2510 = vmatprep.mubr.msk.f32.mxu0 %vm3176_vm0, %v3175_v8  ;;  %v1832_v8 = vld [vmem:[%s4054_s5] sm:$0xff]  ;;  %s3177_s5 = smov [#allocation6]  }
 0xd4a   :  { %v3018_v63 = vpack.c.bf16 %v1833_v36, %v1832_v8  ;;  %s1942_s1 = sshll.u32 %s3177_s5, 4  ;;  %s1943_s1 = int_to_ptr.vmem [resolvable:$true] %s1942_s1 }
 0xd4b   :  { %s3126_s18 = scalar_lea.vmem %s1943_s1, 128  ;;  %p3131_p1 = scmp.lt.s32.totalorder %s1943_s1, %s1943_s1 }
 0xd4c   :  { %3019 = vmatpush3.bf16.msra.mxu0 %v3018_v63  ;;  %p3127_p0 = scmp.ne.s32.totalorder %s1943_s1, %s3126_s18  ;;  %p3132_p2 = scmp.lt.s32.totalorder %s3126_s18, %s3126_s18 }
 0xd4d   :  { %3020 = vmatprep.subr.bf16.mxu0 %v3174_v5 }
 0xd4e   :  { %p3133_p3 = por %p3132_p2, %p3131_p1 }
 0xd50   :  { %3022 = vmatpush3.bf16.msra.mxu0 %v3021_v14  ;;  %p3134_p4 = pnand %p3133_p3, %p3127_p0 }
 0xd51   :  { %3023 = vmatprep.subr.bf16.mxu0 %v3174_v5 }
 0xd54   :  { %3025 = vmatpush3.bf16.msra.mxu0 %v3024_v10 }
 0xd55   :  { %3026 = vmatprep.subr.bf16.mxu0 %v3174_v5 }
 0xd58   :  { %3028 = vmatpush3.bf16.msra.mxu0 %v3027_v16 }
 0xd59   :  { %3029 = vmatprep.subr.bf16.mxu0 %v3174_v5 }
 0xd5c   :  { %3031 = vmatpush3.bf16.msra.mxu0 %v3030_v24 }
 0xd5d   :  { %3032 = vmatprep.subr.bf16.mxu0 %v3174_v5 }
 0xd60   :  { %3034 = vmatpush3.bf16.msra.mxu0 %v3033_v20 }
 0xd61   :  { %3035 = vmatprep.subr.bf16.mxu0 %v3174_v5 }
 0xd64   :  { %3037 = vmatpush3.bf16.msra.mxu0 %v3036_v27 }
 0xd65   :  { %3038 = vmatprep.subr.bf16.mxu0 %v3174_v5 }
 0xd68   :  { %3040 = vmatpush3.bf16.msra.mxu0 %v3039_v38 }
 0xe1b   :  { %v1675_v43 = vpop.f32.mrb[16].mxu0 }
 0xe1c   :  { %v1676_v48 = vadd.f32 %v1675_v43, %v1602_v29  ;;  %v1677_v49 = vpop.f32.mrb[17].mxu0  ;;  %v1826_v29 = vsel %vm1825_vm7, %v1824_v42, %v1807_v2 }
 0xe1d   :  { %v1678_v52 = vadd.f32 %v1677_v49, %v1606_v47 }
 0xe1e   :  { %v1990_v39 = vmul.f32 -1.442695, %v1676_v48 }
 0xe1f   :  { %v1991_v53 = vmul.f32 -1.442695, %v1678_v52 }
 0xe21   :  { %3116 = vpow2.f32 %v1991_v53 }
 0xe2b   :  { %v3117_v55 = vpop.eup %3116 }
 0xe2c   :  { %v1687_v58 = vadd.f32 1.0, %v3117_v55 }
 0xe2e   :  { %3118 = vrcp.f32 %v1687_v58 }
 0xe2f   :  { %3120 = vpow2.f32 %v1990_v39 }
 0xe38   :  { %v3119_v59 = vpop.eup %3118 }
 0xe39   :  { %v1692_v62 = vmul.f32 %v3119_v59, %v3941_v28  ;;  %v3121_v44 = vpop.eup %3120 }
 0xe3a   :  { %v1686_v51 = vadd.f32 1.0, %v3121_v44 }
 0xe3b   :  { %2476 = vmatmul.mubr.f32.vlgmr.msra.gmra.mrb[16].mxu1 %v1692_v62 }
 0xf0e   :  { %v1764_v50 = vpop.f32.mrb[16].mxu1 }
 0xf0f   :  { %v1765_v56 = vadd.f32 %v1764_v50, %v1696_v45  ;;  %v2477_v57 = vpop.f32.mrb[17].mxu1 }
 0xf11   :  { %3122 = vtanh.f32 %v1765_v56 }
 0xf12   :  { %3124 = vrcp.f32 %v1686_v51 }
 0xf1b   :  { %v3123_v5 = vpop.eup %3122 }
 0xf1c   :  { %v1769_v0 = vsub.f32 %v3123_v5, %v3941_v28  ;;  %v3125_v3 = vpop.eup %3124 }
 0xf1e   :  { %v1770_v11 = vmul.f32 %v3125_v3, %v1769_v0 }
 0xf20   :  { %v1771_v37 = vadd.f32 %v1770_v11, %v3941_v28 }
 0xf22   :  { %v1772_v54 = vmul.f32 %v3668_v40, %v1771_v37 }
 0xf24   :  { %v1813_v46 = vrot.slane %v1772_v54, %v3632_v31  ;;  %1830 = vst [vmem:[#allocation2] sm:$0x1] %v1772_v54 }
 0xf26   :  { %v1828_v43 = vsel %vm1827_vm8, %v1826_v29, %v1813_v46 }
 0xf27   :  { %1829 = vst [vmem:[#allocation6] sm:$0xff] %v1828_v43  ;;  %2511 = vmatmul.mubr.f32.vlgmr.msra.gmra.mrb[18].mxu0 %v1828_v43 }
 0xf28   :  { %3137 = shalt.err (!%p3134_p4)
}
 0xf29   :  { %s3138_s21 = scalar_lea.hbm %s4057_s8, 128 }
 0xf2a   :  { %p3139_p5 = scmp.ne.s32.totalorder %s4057_s8, %s3138_s21  ;;  %p3142_p6 = scmp.lt.u32.totalorder %s3138_s21, %s4057_s8 }
 0xf2c   :  { %p3144_p7 = pnand %p3142_p6, %p3139_p5 }
 0xf2e   :  { %3147 = shalt.err (!%p3144_p7)
}
 0xf2f   :  { %1945 = dma.vmem_to_hbm [thread:$0]  %s1943_s1, 128, %s4057_s8, [#allocation7]   ;;  %v1992_v31 = vld [vmem:[%s4055_s6] ss:$0 sm:$0xff] }
 0xf30   :  { %s3178_s3 = smov [#allocation4]  }
 0xf31   :  { %s1932_s30 = sshll.u32 %s3178_s3, 4  ;;  %s1933_s30 = int_to_ptr.vmem [resolvable:$true] %s1932_s30 }
 0xf32   :  { %s3148_s9 = scalar_lea.vmem %s1933_s30, 128  ;;  %p3153_p9 = scmp.lt.s32.totalorder %s1933_s30, %s1933_s30 }
 0xf33   :  { %p3149_p8 = scmp.ne.s32.totalorder %s1933_s30, %s3148_s9  ;;  %p3154_p10 = scmp.lt.s32.totalorder %s3148_s9, %s3148_s9 }
 0xf35   :  { %p3155_p11 = por %p3154_p10, %p3153_p9 }
 0xf37   :  { %p3156_p12 = pnand %p3155_p11, %p3149_p8 }
 0xffa   :  { %v1921_v40 = vpop.f32.mrb[18].mxu0 }
 0xffb   :  { %v1922_v35 = vadd.f32 %v1992_v31, %v1921_v40  ;;  %v2512_v28 = vpop.f32.mrb[19].mxu0 }
 0xffd   :  { %1925 = vst [vmem:[#allocation4] sm:$0xff] %v1922_v35 }
 0xffe   :  { %3159 = shalt.err (!%p3156_p12)
}
 0xfff   :  { %s3160_s10 = scalar_lea.hbm %s4056_s7, 128 }
0x1000   :  { %p3161_p13 = scmp.ne.s32.totalorder %s4056_s7, %s3160_s10  ;;  %p3164_p0 = scmp.lt.u32.totalorder %s3160_s10, %s4056_s7 }
0x1002   :  { %p3166_p1 = pnand %p3164_p0, %p3161_p13 }
0x1004   :  { %3169 = shalt.err (!%p3166_p1)
}
0x1005   :  { %1935 = dma.vmem_to_hbm [thread:$0]  %s1933_s30, 128, %s4056_s7, [#allocation5]  }
0x1006   :  { %3170 = dma.done.wait [#allocation5], 128  }
0x1007   :  { %3171 = vsyncadd [#allocation5], 4294967168 }
0x1008   :  { %3172 = dma.done.wait [#allocation7], 128  }
0x1009   :  { %3173 = vsyncadd [#allocation7], 4294967168 }
0x100a   :  { %1952 = vsyncpa [#allocation5], 1 }
0x100b   :  { %1953 = vsyncpa [#allocation7], 1 }

</bundles_post_ra>
